<compile_context>
chip_gen: v5e
topology: v5e:2x2
jax: 0.10.0
libtpu: 0.0.40
codegen_flags: <defaults>
</compile_context>

<pallas_src>
import functools

import jax
import jax.numpy as jnp
from jax import lax
from jax.experimental import pallas as pl
from jax.experimental.pallas import tpu as pltpu


def sam_kernel(x_ref, p_ref, o_ref, *, H, W):
    x = x_ref[...]                       # (C, H*W) channel-major, spatial flat
    p = p_ref[...]                       # (C, 9C+20) packed parameters
    C, HW = x.shape
    Hp, Wp = H // 2, W // 2

    # ---- unpack packed parameter columns (static lane slices, one tile) ----
    off = 0

    def take(n):
        nonlocal off
        sl = p[:, off:off + n]
        off += n
        return sl

    w1, b1 = take(C), take(1)            # conv1 weight (Cout,Cin), bias column
    w2, b2 = take(4 * C), take(1)        # conv2 weight (Cout, 4*Cin)
    w3, b3 = take(4 * C), take(1)        # conv3 weight (Cout, 4*Cin)
    iw1, ib1 = take(4), take(4)          # irnn1 per-channel scale/bias, cols [up,right,down,left]
    iw2, ib2 = take(4), take(4)          # irnn2
    wout = take(1)                       # conv_out weight column (no bias)

    # ---- flat-index boundary masks (built once from an iota; no int div) ---
    kf = lax.broadcasted_iota(jnp.int32, (1, HW), 1).astype(jnp.float32)
    rowf = jnp.floor((kf + 0.5) / W)
    colf = kf - rowf * W
    first_row = rowf < 0.5
    last_row = rowf > H - 1.5
    first_col = colf < 0.5
    last_col = colf > W - 1.5

    def irnn(t, iw, ib):
        # t: (C, HW).  Cyclic rolls on the flat lane axis; the wrapped
        # positions are exactly the boundary positions, which keep t.
        t_up = pltpu.roll(t, shift=W, axis=1)        # value from (r-1, c)
        t_rt = pltpu.roll(t, shift=HW - 1, axis=1)   # value from (r, c+1)
        t_dn = pltpu.roll(t, shift=HW - W, axis=1)   # value from (r+1, c)
        t_lf = pltpu.roll(t, shift=1, axis=1)        # value from (r, c-1)
        up = jnp.where(first_row, t,
                       jax.nn.relu(iw[:, 0:1] * t_up + ib[:, 0:1] + t))
        right = jnp.where(last_col, t,
                          jax.nn.relu(iw[:, 1:2] * t_rt + ib[:, 1:2] + t))
        down = jnp.where(last_row, t,
                         jax.nn.relu(iw[:, 2:3] * t_dn + ib[:, 2:3] + t))
        left = jnp.where(first_col, t,
                         jax.nn.relu(iw[:, 3:4] * t_lf + ib[:, 3:4] + t))
        return (up, right, down, left)

    def conv1x1(srcs, wt, b_col):
        # out[co,:] = b[co] + sum_{d,ci} wt[co, d*C+ci] * srcs[d][ci,:]
        # VPU broadcast-FMA on (Cout,1)x(1,HW) terms; no 4C concat, no MXU.
        acc = None
        for d, t in enumerate(srcs):
            for ci in range(C):
                j = d * C + ci
                term = wt[:, j:j + 1] * t[ci:ci + 1, :]
                acc = term if acc is None else acc + term
        return acc + b_col

    h = conv1x1((x,), w1, b1)                              # conv1
    h = conv1x1(irnn(h, iw1, ib1), w2, b2)                 # irnn1 + conv2
    h = jax.nn.relu(conv1x1(irnn(h, iw2, ib2), w3, b3))    # irnn2 + conv3 + relu

    # conv_out (C -> 1, no bias) + sigmoid: sublane reduce (XLU) + EUP.
    mask = jax.nn.sigmoid(jnp.sum(wout * h, axis=0, keepdims=True))  # (1, HW)

    # AvgPool2d(2,2): one selection matmul with an iota-built 0.25 matrix.
    # The result is already a flat, lane-contiguous (1, Hp*Wp) row.
    k2 = lax.broadcasted_iota(jnp.int32, (HW, Hp * Wp), 0).astype(jnp.float32)
    p2 = lax.broadcasted_iota(jnp.int32, (HW, Hp * Wp), 1).astype(jnp.float32)
    r2 = jnp.floor((k2 + 0.5) / W)
    c2 = k2 - r2 * W
    tgt = jnp.floor((r2 + 0.5) / 2.0) * Wp + jnp.floor((c2 + 0.5) / 2.0)
    pool = jnp.where(jnp.abs(tgt - p2) < 0.5, 0.25, 0.0)   # (HW, Hp*Wp)
    mask8 = jnp.broadcast_to(mask, (8, HW))                # avoid degenerate M=1
    pooled = jnp.dot(mask8, pool,
                     preferred_element_type=jnp.float32)[0:1, :]      # (1, Hp*Wp)
    o_ref[...] = pooled


def pack_params(params):
    """Pack all SAM parameters into one (C, 9C+20) f32 array (single DMA)."""
    cols = [
        params['w1'],
        params['b1'][:, None],
        params['w2'],
        params['b2'][:, None],
        params['w3'],
        params['b3'][:, None],
        params['iw1'],
        params['ib1'],
        params['iw2'],
        params['ib2'],
        params['wout'][:, None],
    ]
    return jnp.concatenate(cols, axis=1).astype(jnp.float32)


def sam_forward(x_nchw, params):
    """Pallas SAM forward. x_nchw: (N, C, H, W) -> (N, 1, H/2, W/2)."""
    N, C, H, W = x_nchw.shape
    assert H % 2 == 0 and W % 2 == 0
    HW = H * W
    Hp, Wp = H // 2, W // 2

    x = x_nchw.reshape(N, C, HW).astype(jnp.float32)   # channel-major, flat spatial
    p = pack_params(params)                            # (C, 9C+20)
    NP = p.shape[1]

    kernel = functools.partial(sam_kernel, H=H, W=W)
    out = pl.pallas_call(
        kernel,
        out_shape=jax.ShapeDtypeStruct((N, 1, Hp * Wp), jnp.float32),
        grid=(N,),
        in_specs=[
            pl.BlockSpec((pl.Squeezed(), C, HW), lambda n: (n, 0, 0)),
            pl.BlockSpec((C, NP), lambda n: (0, 0)),
        ],
        out_specs=pl.BlockSpec((pl.Squeezed(), 1, Hp * Wp), lambda n: (n, 0, 0)),
        compiler_params=pltpu.CompilerParams(
            dimension_semantics=("parallel",),
            vmem_limit_bytes=32 * 1024 * 1024),
    )(x, p)
    return out.reshape(N, 1, Hp, Wp)


def sam_reference(x, params):
    """Independent pure-JAX NCHW reference (slice+concat irnn, faithful to PyTorch)."""

    def conv1x1(t, w, b=None):
        y = jnp.einsum('oc,nchw->nohw', w, t)
        if b is not None:
            y = y + b[None, :, None, None]
        return y

    def irnn(t, iw, ib):
        _, _, H, W = t.shape
        col = lambda a, i: a[:, i][None, :, None, None]
        sc = [col(iw, d) * t + col(ib, d) for d in range(4)]  # up,right,down,left
        up = jnp.concatenate(
            [t[:, :, :1, :],
             jax.nn.relu(sc[0][:, :, :H - 1, :] + t[:, :, 1:, :])], axis=2)
        right = jnp.concatenate(
            [jax.nn.relu(sc[1][:, :, :, 1:] + t[:, :, :, :W - 1]),
             t[:, :, :, W - 1:]], axis=3)
        down = jnp.concatenate(
            [jax.nn.relu(sc[2][:, :, 1:, :] + t[:, :, :H - 1, :]),
             t[:, :, H - 1:, :]], axis=2)
        left = jnp.concatenate(
            [t[:, :, :, :1],
             jax.nn.relu(sc[3][:, :, :, :W - 1] + t[:, :, :, 1:])], axis=3)
        return jnp.concatenate([up, right, down, left], axis=1)

    x = x.astype(jnp.float32)
    h = conv1x1(x, params['w1'], params['b1'])
    h = conv1x1(irnn(h, params['iw1'], params['ib1']), params['w2'], params['b2'])
    h = jax.nn.relu(
        conv1x1(irnn(h, params['iw2'], params['ib2']), params['w3'], params['b3']))
    mask = jax.nn.sigmoid(jnp.einsum('c,nchw->nhw', params['wout'], h))[:, None]
    Nb, _, H, W = mask.shape
    return mask.reshape(Nb, 1, H // 2, 2, W // 2, 2).mean(axis=(3, 5))


def init_params(key, C):
    ks = jax.random.split(key, 11)
    s = 0.1
    f = jnp.float32
    return dict(
        w1=jax.random.normal(ks[0], (C, C), f) * s,       # conv1 (Cout, Cin)
        b1=jax.random.normal(ks[1], (C,), f) * s,
        w2=jax.random.normal(ks[2], (C, 4 * C), f) * s,   # conv2 (Cout, 4*Cin)
        b2=jax.random.normal(ks[3], (C,), f) * s,
        w3=jax.random.normal(ks[4], (C, 4 * C), f) * s,   # conv3 (Cout, 4*Cin)
        b3=jax.random.normal(ks[5], (C,), f) * s,
        iw1=jax.random.normal(ks[6], (C, 4), f) * s,      # irnn1 [up,right,down,left]
        ib1=jax.random.normal(ks[7], (C, 4), f) * s,
        iw2=jax.random.normal(ks[8], (C, 4), f) * s,      # irnn2
        ib2=jax.random.normal(ks[9], (C, 4), f) * s,
        wout=jax.random.normal(ks[10], (C,), f) * s,      # conv_out (no bias)
    )


if __name__ == "__main__":
    # SAM.forward requires in_channels == out_channels (conv1 is applied to x).
    N, C, H, W = 2, 4, 16, 16
    key = jax.random.PRNGKey(0)
    kx, kp = jax.random.split(key)
    x = jax.random.normal(kx, (N, C, H, W), dtype=jnp.float32)
    params = init_params(kp, C)

    out = jax.block_until_ready(sam_forward(x, params))
    ref = jax.block_until_ready(sam_reference(x, params))

    assert out.shape == (N, 1, H // 2, W // 2), out.shape
    assert jnp.allclose(out, ref, atol=1e-5, rtol=1e-5), \
        float(jnp.max(jnp.abs(out - ref)))
    print("KERNEL_OK")
</pallas_src>

<mosaic_0001>
module attributes {stable_mosaic.version = 11 : i64} {
  func.func @sam_kernel(%arg0: i32, %arg1: memref<1x4x256xf32, #tpu.memory_space<vmem>>, %arg2: memref<4x56xf32, #tpu.memory_space<vmem>>, %arg3: memref<1x1x64xf32, #tpu.memory_space<vmem>>) attributes {dimension_semantics = [#tpu.dimension_semantics<parallel>], iteration_bounds = array<i64: 2>, scalar_prefetch = 0 : i64, scratch_operands = 0 : i64, tpu.core_type = #tpu.core_type<tc>, window_params = [{transform_indices = @transform_0, window_bounds = array<i64: 1, 4, 256>}, {pipeline_mode = #tpu.pipeline_mode<synchronous>, transform_indices = @transform_1, window_bounds = array<i64: 4, 56>}, {transform_indices = @transform_2, window_bounds = array<i64: 1, 1, 64>}]} {
    %c0 = arith.constant 0 : index
    %c0_0 = arith.constant 0 : index
    %c0_1 = arith.constant 0 : index
    %0 = vector.load %arg1[%c0, %c0_0, %c0_1] : memref<1x4x256xf32, #tpu.memory_space<vmem>>, vector<1x4x256xf32>
    %1 = vector.shape_cast %0 : vector<1x4x256xf32> to vector<4x256xf32>
    %c0_2 = arith.constant 0 : index
    %c0_3 = arith.constant 0 : index
    %2 = vector.load %arg2[%c0_2, %c0_3] : memref<4x56xf32, #tpu.memory_space<vmem>>, vector<4x56xf32>
    %3 = vector.extract_strided_slice %2 {offsets = [0, 0], sizes = [4, 4], strides = [1, 1]} : vector<4x56xf32> to vector<4x4xf32>
    %4 = vector.extract_strided_slice %2 {offsets = [0, 4], sizes = [4, 1], strides = [1, 1]} : vector<4x56xf32> to vector<4x1xf32>
    %5 = vector.extract_strided_slice %2 {offsets = [0, 5], sizes = [4, 16], strides = [1, 1]} : vector<4x56xf32> to vector<4x16xf32>
    %6 = vector.extract_strided_slice %2 {offsets = [0, 21], sizes = [4, 1], strides = [1, 1]} : vector<4x56xf32> to vector<4x1xf32>
    %7 = vector.extract_strided_slice %2 {offsets = [0, 22], sizes = [4, 16], strides = [1, 1]} : vector<4x56xf32> to vector<4x16xf32>
    %8 = vector.extract_strided_slice %2 {offsets = [0, 38], sizes = [4, 1], strides = [1, 1]} : vector<4x56xf32> to vector<4x1xf32>
    %9 = vector.extract_strided_slice %2 {offsets = [0, 39], sizes = [4, 4], strides = [1, 1]} : vector<4x56xf32> to vector<4x4xf32>
    %10 = vector.extract_strided_slice %2 {offsets = [0, 43], sizes = [4, 4], strides = [1, 1]} : vector<4x56xf32> to vector<4x4xf32>
    %11 = vector.extract_strided_slice %2 {offsets = [0, 47], sizes = [4, 4], strides = [1, 1]} : vector<4x56xf32> to vector<4x4xf32>
    %12 = vector.extract_strided_slice %2 {offsets = [0, 51], sizes = [4, 4], strides = [1, 1]} : vector<4x56xf32> to vector<4x4xf32>
    %13 = vector.extract_strided_slice %2 {offsets = [0, 55], sizes = [4, 1], strides = [1, 1]} : vector<4x56xf32> to vector<4x1xf32>
    %14 = tpu.iota {dimensions = array<i32: 1>} : vector<1x256xi32>
    %15 = arith.sitofp %14 : vector<1x256xi32> to vector<1x256xf32>
    %cst = arith.constant 5.000000e-01 : f32
    %16 = vector.broadcast %cst : f32 to vector<1x256xf32>
    %17 = arith.addf %15, %16 : vector<1x256xf32>
    %cst_4 = arith.constant 1.600000e+01 : f32
    %18 = vector.broadcast %cst_4 : f32 to vector<1x256xf32>
    %19 = arith.divf %17, %18 : vector<1x256xf32>
    %20 = math.floor %19 : vector<1x256xf32>
    %cst_5 = arith.constant 1.600000e+01 : f32
    %21 = vector.broadcast %cst_5 : f32 to vector<1x256xf32>
    %22 = arith.mulf %20, %21 : vector<1x256xf32>
    %23 = arith.subf %15, %22 : vector<1x256xf32>
    %cst_6 = arith.constant 5.000000e-01 : f32
    %24 = vector.broadcast %cst_6 : f32 to vector<1x256xf32>
    %25 = arith.cmpf olt, %20, %24 : vector<1x256xf32>
    %cst_7 = arith.constant 1.450000e+01 : f32
    %26 = vector.broadcast %cst_7 : f32 to vector<1x256xf32>
    %27 = arith.cmpf ogt, %20, %26 : vector<1x256xf32>
    %cst_8 = arith.constant 5.000000e-01 : f32
    %28 = vector.broadcast %cst_8 : f32 to vector<1x256xf32>
    %29 = arith.cmpf olt, %23, %28 : vector<1x256xf32>
    %cst_9 = arith.constant 1.450000e+01 : f32
    %30 = vector.broadcast %cst_9 : f32 to vector<1x256xf32>
    %31 = arith.cmpf ogt, %23, %30 : vector<1x256xf32>
    %32 = vector.extract_strided_slice %3 {offsets = [0, 0], sizes = [4, 1], strides = [1, 1]} : vector<4x4xf32> to vector<4x1xf32>
    %33 = vector.extract_strided_slice %1 {offsets = [0, 0], sizes = [1, 256], strides = [1, 1]} : vector<4x256xf32> to vector<1x256xf32>
    %34 = vector.broadcast %32 : vector<4x1xf32> to vector<4x256xf32>
    %35 = vector.broadcast %33 : vector<1x256xf32> to vector<4x256xf32>
    %36 = arith.mulf %34, %35 : vector<4x256xf32>
    %37 = vector.extract_strided_slice %3 {offsets = [0, 1], sizes = [4, 1], strides = [1, 1]} : vector<4x4xf32> to vector<4x1xf32>
    %38 = vector.extract_strided_slice %1 {offsets = [1, 0], sizes = [1, 256], strides = [1, 1]} : vector<4x256xf32> to vector<1x256xf32>
    %39 = vector.broadcast %37 : vector<4x1xf32> to vector<4x256xf32>
    %40 = vector.broadcast %38 : vector<1x256xf32> to vector<4x256xf32>
    %41 = arith.mulf %39, %40 : vector<4x256xf32>
    %42 = arith.addf %36, %41 : vector<4x256xf32>
    %43 = vector.extract_strided_slice %3 {offsets = [0, 2], sizes = [4, 1], strides = [1, 1]} : vector<4x4xf32> to vector<4x1xf32>
    %44 = vector.extract_strided_slice %1 {offsets = [2, 0], sizes = [1, 256], strides = [1, 1]} : vector<4x256xf32> to vector<1x256xf32>
    %45 = vector.broadcast %43 : vector<4x1xf32> to vector<4x256xf32>
    %46 = vector.broadcast %44 : vector<1x256xf32> to vector<4x256xf32>
    %47 = arith.mulf %45, %46 : vector<4x256xf32>
    %48 = arith.addf %42, %47 : vector<4x256xf32>
    %49 = vector.extract_strided_slice %3 {offsets = [0, 3], sizes = [4, 1], strides = [1, 1]} : vector<4x4xf32> to vector<4x1xf32>
    %50 = vector.extract_strided_slice %1 {offsets = [3, 0], sizes = [1, 256], strides = [1, 1]} : vector<4x256xf32> to vector<1x256xf32>
    %51 = vector.broadcast %49 : vector<4x1xf32> to vector<4x256xf32>
    %52 = vector.broadcast %50 : vector<1x256xf32> to vector<4x256xf32>
    %53 = arith.mulf %51, %52 : vector<4x256xf32>
    %54 = arith.addf %48, %53 : vector<4x256xf32>
    %55 = vector.broadcast %4 : vector<4x1xf32> to vector<4x256xf32>
    %56 = arith.addf %54, %55 : vector<4x256xf32>
    %c16_i32 = arith.constant 16 : i32
    %57 = tpu.dynamic_rotate %56 by %c16_i32 dim 1 : vector<4x256xf32>, i32 -> vector<4x256xf32>
    %c255_i32 = arith.constant 255 : i32
    %58 = tpu.dynamic_rotate %56 by %c255_i32 dim 1 : vector<4x256xf32>, i32 -> vector<4x256xf32>
    %c240_i32 = arith.constant 240 : i32
    %59 = tpu.dynamic_rotate %56 by %c240_i32 dim 1 : vector<4x256xf32>, i32 -> vector<4x256xf32>
    %c1_i32 = arith.constant 1 : i32
    %60 = tpu.dynamic_rotate %56 by %c1_i32 dim 1 : vector<4x256xf32>, i32 -> vector<4x256xf32>
    %61 = vector.extract_strided_slice %9 {offsets = [0, 0], sizes = [4, 1], strides = [1, 1]} : vector<4x4xf32> to vector<4x1xf32>
    %62 = vector.broadcast %61 : vector<4x1xf32> to vector<4x256xf32>
    %63 = arith.mulf %62, %57 : vector<4x256xf32>
    %64 = vector.extract_strided_slice %10 {offsets = [0, 0], sizes = [4, 1], strides = [1, 1]} : vector<4x4xf32> to vector<4x1xf32>
    %65 = vector.broadcast %64 : vector<4x1xf32> to vector<4x256xf32>
    %66 = arith.addf %63, %65 : vector<4x256xf32>
    %67 = arith.addf %66, %56 : vector<4x256xf32>
    %cst_10 = arith.constant 0.000000e+00 : f32
    %68 = vector.broadcast %cst_10 : f32 to vector<4x256xf32>
    %69 = arith.maximumf %67, %68 : vector<4x256xf32>
    %70 = vector.shape_cast %25 : vector<1x256xi1> to vector<1x256xi1>
    %71 = vector.broadcast %70 : vector<1x256xi1> to vector<4x256xi1>
    %72 = arith.select %71, %56, %69 : vector<4x256xi1>, vector<4x256xf32>
    %73 = vector.extract_strided_slice %9 {offsets = [0, 1], sizes = [4, 1], strides = [1, 1]} : vector<4x4xf32> to vector<4x1xf32>
    %74 = vector.broadcast %73 : vector<4x1xf32> to vector<4x256xf32>
    %75 = arith.mulf %74, %58 : vector<4x256xf32>
    %76 = vector.extract_strided_slice %10 {offsets = [0, 1], sizes = [4, 1], strides = [1, 1]} : vector<4x4xf32> to vector<4x1xf32>
    %77 = vector.broadcast %76 : vector<4x1xf32> to vector<4x256xf32>
    %78 = arith.addf %75, %77 : vector<4x256xf32>
    %79 = arith.addf %78, %56 : vector<4x256xf32>
    %cst_11 = arith.constant 0.000000e+00 : f32
    %80 = vector.broadcast %cst_11 : f32 to vector<4x256xf32>
    %81 = arith.maximumf %79, %80 : vector<4x256xf32>
    %82 = vector.shape_cast %31 : vector<1x256xi1> to vector<1x256xi1>
    %83 = vector.broadcast %82 : vector<1x256xi1> to vector<4x256xi1>
    %84 = arith.select %83, %56, %81 : vector<4x256xi1>, vector<4x256xf32>
    %85 = vector.extract_strided_slice %9 {offsets = [0, 2], sizes = [4, 1], strides = [1, 1]} : vector<4x4xf32> to vector<4x1xf32>
    %86 = vector.broadcast %85 : vector<4x1xf32> to vector<4x256xf32>
    %87 = arith.mulf %86, %59 : vector<4x256xf32>
    %88 = vector.extract_strided_slice %10 {offsets = [0, 2], sizes = [4, 1], strides = [1, 1]} : vector<4x4xf32> to vector<4x1xf32>
    %89 = vector.broadcast %88 : vector<4x1xf32> to vector<4x256xf32>
    %90 = arith.addf %87, %89 : vector<4x256xf32>
    %91 = arith.addf %90, %56 : vector<4x256xf32>
    %cst_12 = arith.constant 0.000000e+00 : f32
    %92 = vector.broadcast %cst_12 : f32 to vector<4x256xf32>
    %93 = arith.maximumf %91, %92 : vector<4x256xf32>
    %94 = vector.shape_cast %27 : vector<1x256xi1> to vector<1x256xi1>
    %95 = vector.broadcast %94 : vector<1x256xi1> to vector<4x256xi1>
    %96 = arith.select %95, %56, %93 : vector<4x256xi1>, vector<4x256xf32>
    %97 = vector.extract_strided_slice %9 {offsets = [0, 3], sizes = [4, 1], strides = [1, 1]} : vector<4x4xf32> to vector<4x1xf32>
    %98 = vector.broadcast %97 : vector<4x1xf32> to vector<4x256xf32>
    %99 = arith.mulf %98, %60 : vector<4x256xf32>
    %100 = vector.extract_strided_slice %10 {offsets = [0, 3], sizes = [4, 1], strides = [1, 1]} : vector<4x4xf32> to vector<4x1xf32>
    %101 = vector.broadcast %100 : vector<4x1xf32> to vector<4x256xf32>
    %102 = arith.addf %99, %101 : vector<4x256xf32>
    %103 = arith.addf %102, %56 : vector<4x256xf32>
    %cst_13 = arith.constant 0.000000e+00 : f32
    %104 = vector.broadcast %cst_13 : f32 to vector<4x256xf32>
    %105 = arith.maximumf %103, %104 : vector<4x256xf32>
    %106 = vector.shape_cast %29 : vector<1x256xi1> to vector<1x256xi1>
    %107 = vector.broadcast %106 : vector<1x256xi1> to vector<4x256xi1>
    %108 = arith.select %107, %56, %105 : vector<4x256xi1>, vector<4x256xf32>
    %109 = vector.extract_strided_slice %5 {offsets = [0, 0], sizes = [4, 1], strides = [1, 1]} : vector<4x16xf32> to vector<4x1xf32>
    %110 = vector.extract_strided_slice %72 {offsets = [0, 0], sizes = [1, 256], strides = [1, 1]} : vector<4x256xf32> to vector<1x256xf32>
    %111 = vector.broadcast %109 : vector<4x1xf32> to vector<4x256xf32>
    %112 = vector.broadcast %110 : vector<1x256xf32> to vector<4x256xf32>
    %113 = arith.mulf %111, %112 : vector<4x256xf32>
    %114 = vector.extract_strided_slice %5 {offsets = [0, 1], sizes = [4, 1], strides = [1, 1]} : vector<4x16xf32> to vector<4x1xf32>
    %115 = vector.extract_strided_slice %72 {offsets = [1, 0], sizes = [1, 256], strides = [1, 1]} : vector<4x256xf32> to vector<1x256xf32>
    %116 = vector.broadcast %114 : vector<4x1xf32> to vector<4x256xf32>
    %117 = vector.broadcast %115 : vector<1x256xf32> to vector<4x256xf32>
    %118 = arith.mulf %116, %117 : vector<4x256xf32>
    %119 = arith.addf %113, %118 : vector<4x256xf32>
    %120 = vector.extract_strided_slice %5 {offsets = [0, 2], sizes = [4, 1], strides = [1, 1]} : vector<4x16xf32> to vector<4x1xf32>
    %121 = vector.extract_strided_slice %72 {offsets = [2, 0], sizes = [1, 256], strides = [1, 1]} : vector<4x256xf32> to vector<1x256xf32>
    %122 = vector.broadcast %120 : vector<4x1xf32> to vector<4x256xf32>
    %123 = vector.broadcast %121 : vector<1x256xf32> to vector<4x256xf32>
    %124 = arith.mulf %122, %123 : vector<4x256xf32>
    %125 = arith.addf %119, %124 : vector<4x256xf32>
    %126 = vector.extract_strided_slice %5 {offsets = [0, 3], sizes = [4, 1], strides = [1, 1]} : vector<4x16xf32> to vector<4x1xf32>
    %127 = vector.extract_strided_slice %72 {offsets = [3, 0], sizes = [1, 256], strides = [1, 1]} : vector<4x256xf32> to vector<1x256xf32>
    %128 = vector.broadcast %126 : vector<4x1xf32> to vector<4x256xf32>
    %129 = vector.broadcast %127 : vector<1x256xf32> to vector<4x256xf32>
    %130 = arith.mulf %128, %129 : vector<4x256xf32>
    %131 = arith.addf %125, %130 : vector<4x256xf32>
    %132 = vector.extract_strided_slice %5 {offsets = [0, 4], sizes = [4, 1], strides = [1, 1]} : vector<4x16xf32> to vector<4x1xf32>
    %133 = vector.extract_strided_slice %84 {offsets = [0, 0], sizes = [1, 256], strides = [1, 1]} : vector<4x256xf32> to vector<1x256xf32>
    %134 = vector.broadcast %132 : vector<4x1xf32> to vector<4x256xf32>
    %135 = vector.broadcast %133 : vector<1x256xf32> to vector<4x256xf32>
    %136 = arith.mulf %134, %135 : vector<4x256xf32>
    %137 = arith.addf %131, %136 : vector<4x256xf32>
    %138 = vector.extract_strided_slice %5 {offsets = [0, 5], sizes = [4, 1], strides = [1, 1]} : vector<4x16xf32> to vector<4x1xf32>
    %139 = vector.extract_strided_slice %84 {offsets = [1, 0], sizes = [1, 256], strides = [1, 1]} : vector<4x256xf32> to vector<1x256xf32>
    %140 = vector.broadcast %138 : vector<4x1xf32> to vector<4x256xf32>
    %141 = vector.broadcast %139 : vector<1x256xf32> to vector<4x256xf32>
    %142 = arith.mulf %140, %141 : vector<4x256xf32>
    %143 = arith.addf %137, %142 : vector<4x256xf32>
    %144 = vector.extract_strided_slice %5 {offsets = [0, 6], sizes = [4, 1], strides = [1, 1]} : vector<4x16xf32> to vector<4x1xf32>
    %145 = vector.extract_strided_slice %84 {offsets = [2, 0], sizes = [1, 256], strides = [1, 1]} : vector<4x256xf32> to vector<1x256xf32>
    %146 = vector.broadcast %144 : vector<4x1xf32> to vector<4x256xf32>
    %147 = vector.broadcast %145 : vector<1x256xf32> to vector<4x256xf32>
    %148 = arith.mulf %146, %147 : vector<4x256xf32>
    %149 = arith.addf %143, %148 : vector<4x256xf32>
    %150 = vector.extract_strided_slice %5 {offsets = [0, 7], sizes = [4, 1], strides = [1, 1]} : vector<4x16xf32> to vector<4x1xf32>
    %151 = vector.extract_strided_slice %84 {offsets = [3, 0], sizes = [1, 256], strides = [1, 1]} : vector<4x256xf32> to vector<1x256xf32>
    %152 = vector.broadcast %150 : vector<4x1xf32> to vector<4x256xf32>
    %153 = vector.broadcast %151 : vector<1x256xf32> to vector<4x256xf32>
    %154 = arith.mulf %152, %153 : vector<4x256xf32>
    %155 = arith.addf %149, %154 : vector<4x256xf32>
    %156 = vector.extract_strided_slice %5 {offsets = [0, 8], sizes = [4, 1], strides = [1, 1]} : vector<4x16xf32> to vector<4x1xf32>
    %157 = vector.extract_strided_slice %96 {offsets = [0, 0], sizes = [1, 256], strides = [1, 1]} : vector<4x256xf32> to vector<1x256xf32>
    %158 = vector.broadcast %156 : vector<4x1xf32> to vector<4x256xf32>
    %159 = vector.broadcast %157 : vector<1x256xf32> to vector<4x256xf32>
    %160 = arith.mulf %158, %159 : vector<4x256xf32>
    %161 = arith.addf %155, %160 : vector<4x256xf32>
    %162 = vector.extract_strided_slice %5 {offsets = [0, 9], sizes = [4, 1], strides = [1, 1]} : vector<4x16xf32> to vector<4x1xf32>
    %163 = vector.extract_strided_slice %96 {offsets = [1, 0], sizes = [1, 256], strides = [1, 1]} : vector<4x256xf32> to vector<1x256xf32>
    %164 = vector.broadcast %162 : vector<4x1xf32> to vector<4x256xf32>
    %165 = vector.broadcast %163 : vector<1x256xf32> to vector<4x256xf32>
    %166 = arith.mulf %164, %165 : vector<4x256xf32>
    %167 = arith.addf %161, %166 : vector<4x256xf32>
    %168 = vector.extract_strided_slice %5 {offsets = [0, 10], sizes = [4, 1], strides = [1, 1]} : vector<4x16xf32> to vector<4x1xf32>
    %169 = vector.extract_strided_slice %96 {offsets = [2, 0], sizes = [1, 256], strides = [1, 1]} : vector<4x256xf32> to vector<1x256xf32>
    %170 = vector.broadcast %168 : vector<4x1xf32> to vector<4x256xf32>
    %171 = vector.broadcast %169 : vector<1x256xf32> to vector<4x256xf32>
    %172 = arith.mulf %170, %171 : vector<4x256xf32>
    %173 = arith.addf %167, %172 : vector<4x256xf32>
    %174 = vector.extract_strided_slice %5 {offsets = [0, 11], sizes = [4, 1], strides = [1, 1]} : vector<4x16xf32> to vector<4x1xf32>
    %175 = vector.extract_strided_slice %96 {offsets = [3, 0], sizes = [1, 256], strides = [1, 1]} : vector<4x256xf32> to vector<1x256xf32>
    %176 = vector.broadcast %174 : vector<4x1xf32> to vector<4x256xf32>
    %177 = vector.broadcast %175 : vector<1x256xf32> to vector<4x256xf32>
    %178 = arith.mulf %176, %177 : vector<4x256xf32>
    %179 = arith.addf %173, %178 : vector<4x256xf32>
    %180 = vector.extract_strided_slice %5 {offsets = [0, 12], sizes = [4, 1], strides = [1, 1]} : vector<4x16xf32> to vector<4x1xf32>
    %181 = vector.extract_strided_slice %108 {offsets = [0, 0], sizes = [1, 256], strides = [1, 1]} : vector<4x256xf32> to vector<1x256xf32>
    %182 = vector.broadcast %180 : vector<4x1xf32> to vector<4x256xf32>
    %183 = vector.broadcast %181 : vector<1x256xf32> to vector<4x256xf32>
    %184 = arith.mulf %182, %183 : vector<4x256xf32>
    %185 = arith.addf %179, %184 : vector<4x256xf32>
    %186 = vector.extract_strided_slice %5 {offsets = [0, 13], sizes = [4, 1], strides = [1, 1]} : vector<4x16xf32> to vector<4x1xf32>
    %187 = vector.extract_strided_slice %108 {offsets = [1, 0], sizes = [1, 256], strides = [1, 1]} : vector<4x256xf32> to vector<1x256xf32>
    %188 = vector.broadcast %186 : vector<4x1xf32> to vector<4x256xf32>
    %189 = vector.broadcast %187 : vector<1x256xf32> to vector<4x256xf32>
    %190 = arith.mulf %188, %189 : vector<4x256xf32>
    %191 = arith.addf %185, %190 : vector<4x256xf32>
    %192 = vector.extract_strided_slice %5 {offsets = [0, 14], sizes = [4, 1], strides = [1, 1]} : vector<4x16xf32> to vector<4x1xf32>
    %193 = vector.extract_strided_slice %108 {offsets = [2, 0], sizes = [1, 256], strides = [1, 1]} : vector<4x256xf32> to vector<1x256xf32>
    %194 = vector.broadcast %192 : vector<4x1xf32> to vector<4x256xf32>
    %195 = vector.broadcast %193 : vector<1x256xf32> to vector<4x256xf32>
    %196 = arith.mulf %194, %195 : vector<4x256xf32>
    %197 = arith.addf %191, %196 : vector<4x256xf32>
    %198 = vector.extract_strided_slice %5 {offsets = [0, 15], sizes = [4, 1], strides = [1, 1]} : vector<4x16xf32> to vector<4x1xf32>
    %199 = vector.extract_strided_slice %108 {offsets = [3, 0], sizes = [1, 256], strides = [1, 1]} : vector<4x256xf32> to vector<1x256xf32>
    %200 = vector.broadcast %198 : vector<4x1xf32> to vector<4x256xf32>
    %201 = vector.broadcast %199 : vector<1x256xf32> to vector<4x256xf32>
    %202 = arith.mulf %200, %201 : vector<4x256xf32>
    %203 = arith.addf %197, %202 : vector<4x256xf32>
    %204 = vector.broadcast %6 : vector<4x1xf32> to vector<4x256xf32>
    %205 = arith.addf %203, %204 : vector<4x256xf32>
    %c16_i32_14 = arith.constant 16 : i32
    %206 = tpu.dynamic_rotate %205 by %c16_i32_14 dim 1 : vector<4x256xf32>, i32 -> vector<4x256xf32>
    %c255_i32_15 = arith.constant 255 : i32
    %207 = tpu.dynamic_rotate %205 by %c255_i32_15 dim 1 : vector<4x256xf32>, i32 -> vector<4x256xf32>
    %c240_i32_16 = arith.constant 240 : i32
    %208 = tpu.dynamic_rotate %205 by %c240_i32_16 dim 1 : vector<4x256xf32>, i32 -> vector<4x256xf32>
    %c1_i32_17 = arith.constant 1 : i32
    %209 = tpu.dynamic_rotate %205 by %c1_i32_17 dim 1 : vector<4x256xf32>, i32 -> vector<4x256xf32>
    %210 = vector.extract_strided_slice %11 {offsets = [0, 0], sizes = [4, 1], strides = [1, 1]} : vector<4x4xf32> to vector<4x1xf32>
    %211 = vector.broadcast %210 : vector<4x1xf32> to vector<4x256xf32>
    %212 = arith.mulf %211, %206 : vector<4x256xf32>
    %213 = vector.extract_strided_slice %12 {offsets = [0, 0], sizes = [4, 1], strides = [1, 1]} : vector<4x4xf32> to vector<4x1xf32>
    %214 = vector.broadcast %213 : vector<4x1xf32> to vector<4x256xf32>
    %215 = arith.addf %212, %214 : vector<4x256xf32>
    %216 = arith.addf %215, %205 : vector<4x256xf32>
    %cst_18 = arith.constant 0.000000e+00 : f32
    %217 = vector.broadcast %cst_18 : f32 to vector<4x256xf32>
    %218 = arith.maximumf %216, %217 : vector<4x256xf32>
    %219 = vector.shape_cast %25 : vector<1x256xi1> to vector<1x256xi1>
    %220 = vector.broadcast %219 : vector<1x256xi1> to vector<4x256xi1>
    %221 = arith.select %220, %205, %218 : vector<4x256xi1>, vector<4x256xf32>
    %222 = vector.extract_strided_slice %11 {offsets = [0, 1], sizes = [4, 1], strides = [1, 1]} : vector<4x4xf32> to vector<4x1xf32>
    %223 = vector.broadcast %222 : vector<4x1xf32> to vector<4x256xf32>
    %224 = arith.mulf %223, %207 : vector<4x256xf32>
    %225 = vector.extract_strided_slice %12 {offsets = [0, 1], sizes = [4, 1], strides = [1, 1]} : vector<4x4xf32> to vector<4x1xf32>
    %226 = vector.broadcast %225 : vector<4x1xf32> to vector<4x256xf32>
    %227 = arith.addf %224, %226 : vector<4x256xf32>
    %228 = arith.addf %227, %205 : vector<4x256xf32>
    %cst_19 = arith.constant 0.000000e+00 : f32
    %229 = vector.broadcast %cst_19 : f32 to vector<4x256xf32>
    %230 = arith.maximumf %228, %229 : vector<4x256xf32>
    %231 = vector.shape_cast %31 : vector<1x256xi1> to vector<1x256xi1>
    %232 = vector.broadcast %231 : vector<1x256xi1> to vector<4x256xi1>
    %233 = arith.select %232, %205, %230 : vector<4x256xi1>, vector<4x256xf32>
    %234 = vector.extract_strided_slice %11 {offsets = [0, 2], sizes = [4, 1], strides = [1, 1]} : vector<4x4xf32> to vector<4x1xf32>
    %235 = vector.broadcast %234 : vector<4x1xf32> to vector<4x256xf32>
    %236 = arith.mulf %235, %208 : vector<4x256xf32>
    %237 = vector.extract_strided_slice %12 {offsets = [0, 2], sizes = [4, 1], strides = [1, 1]} : vector<4x4xf32> to vector<4x1xf32>
    %238 = vector.broadcast %237 : vector<4x1xf32> to vector<4x256xf32>
    %239 = arith.addf %236, %238 : vector<4x256xf32>
    %240 = arith.addf %239, %205 : vector<4x256xf32>
    %cst_20 = arith.constant 0.000000e+00 : f32
    %241 = vector.broadcast %cst_20 : f32 to vector<4x256xf32>
    %242 = arith.maximumf %240, %241 : vector<4x256xf32>
    %243 = vector.shape_cast %27 : vector<1x256xi1> to vector<1x256xi1>
    %244 = vector.broadcast %243 : vector<1x256xi1> to vector<4x256xi1>
    %245 = arith.select %244, %205, %242 : vector<4x256xi1>, vector<4x256xf32>
    %246 = vector.extract_strided_slice %11 {offsets = [0, 3], sizes = [4, 1], strides = [1, 1]} : vector<4x4xf32> to vector<4x1xf32>
    %247 = vector.broadcast %246 : vector<4x1xf32> to vector<4x256xf32>
    %248 = arith.mulf %247, %209 : vector<4x256xf32>
    %249 = vector.extract_strided_slice %12 {offsets = [0, 3], sizes = [4, 1], strides = [1, 1]} : vector<4x4xf32> to vector<4x1xf32>
    %250 = vector.broadcast %249 : vector<4x1xf32> to vector<4x256xf32>
    %251 = arith.addf %248, %250 : vector<4x256xf32>
    %252 = arith.addf %251, %205 : vector<4x256xf32>
    %cst_21 = arith.constant 0.000000e+00 : f32
    %253 = vector.broadcast %cst_21 : f32 to vector<4x256xf32>
    %254 = arith.maximumf %252, %253 : vector<4x256xf32>
    %255 = vector.shape_cast %29 : vector<1x256xi1> to vector<1x256xi1>
    %256 = vector.broadcast %255 : vector<1x256xi1> to vector<4x256xi1>
    %257 = arith.select %256, %205, %254 : vector<4x256xi1>, vector<4x256xf32>
    %258 = vector.extract_strided_slice %7 {offsets = [0, 0], sizes = [4, 1], strides = [1, 1]} : vector<4x16xf32> to vector<4x1xf32>
    %259 = vector.extract_strided_slice %221 {offsets = [0, 0], sizes = [1, 256], strides = [1, 1]} : vector<4x256xf32> to vector<1x256xf32>
    %260 = vector.broadcast %258 : vector<4x1xf32> to vector<4x256xf32>
    %261 = vector.broadcast %259 : vector<1x256xf32> to vector<4x256xf32>
    %262 = arith.mulf %260, %261 : vector<4x256xf32>
    %263 = vector.extract_strided_slice %7 {offsets = [0, 1], sizes = [4, 1], strides = [1, 1]} : vector<4x16xf32> to vector<4x1xf32>
    %264 = vector.extract_strided_slice %221 {offsets = [1, 0], sizes = [1, 256], strides = [1, 1]} : vector<4x256xf32> to vector<1x256xf32>
    %265 = vector.broadcast %263 : vector<4x1xf32> to vector<4x256xf32>
    %266 = vector.broadcast %264 : vector<1x256xf32> to vector<4x256xf32>
    %267 = arith.mulf %265, %266 : vector<4x256xf32>
    %268 = arith.addf %262, %267 : vector<4x256xf32>
    %269 = vector.extract_strided_slice %7 {offsets = [0, 2], sizes = [4, 1], strides = [1, 1]} : vector<4x16xf32> to vector<4x1xf32>
    %270 = vector.extract_strided_slice %221 {offsets = [2, 0], sizes = [1, 256], strides = [1, 1]} : vector<4x256xf32> to vector<1x256xf32>
    %271 = vector.broadcast %269 : vector<4x1xf32> to vector<4x256xf32>
    %272 = vector.broadcast %270 : vector<1x256xf32> to vector<4x256xf32>
    %273 = arith.mulf %271, %272 : vector<4x256xf32>
    %274 = arith.addf %268, %273 : vector<4x256xf32>
    %275 = vector.extract_strided_slice %7 {offsets = [0, 3], sizes = [4, 1], strides = [1, 1]} : vector<4x16xf32> to vector<4x1xf32>
    %276 = vector.extract_strided_slice %221 {offsets = [3, 0], sizes = [1, 256], strides = [1, 1]} : vector<4x256xf32> to vector<1x256xf32>
    %277 = vector.broadcast %275 : vector<4x1xf32> to vector<4x256xf32>
    %278 = vector.broadcast %276 : vector<1x256xf32> to vector<4x256xf32>
    %279 = arith.mulf %277, %278 : vector<4x256xf32>
    %280 = arith.addf %274, %279 : vector<4x256xf32>
    %281 = vector.extract_strided_slice %7 {offsets = [0, 4], sizes = [4, 1], strides = [1, 1]} : vector<4x16xf32> to vector<4x1xf32>
    %282 = vector.extract_strided_slice %233 {offsets = [0, 0], sizes = [1, 256], strides = [1, 1]} : vector<4x256xf32> to vector<1x256xf32>
    %283 = vector.broadcast %281 : vector<4x1xf32> to vector<4x256xf32>
    %284 = vector.broadcast %282 : vector<1x256xf32> to vector<4x256xf32>
    %285 = arith.mulf %283, %284 : vector<4x256xf32>
    %286 = arith.addf %280, %285 : vector<4x256xf32>
    %287 = vector.extract_strided_slice %7 {offsets = [0, 5], sizes = [4, 1], strides = [1, 1]} : vector<4x16xf32> to vector<4x1xf32>
    %288 = vector.extract_strided_slice %233 {offsets = [1, 0], sizes = [1, 256], strides = [1, 1]} : vector<4x256xf32> to vector<1x256xf32>
    %289 = vector.broadcast %287 : vector<4x1xf32> to vector<4x256xf32>
    %290 = vector.broadcast %288 : vector<1x256xf32> to vector<4x256xf32>
    %291 = arith.mulf %289, %290 : vector<4x256xf32>
    %292 = arith.addf %286, %291 : vector<4x256xf32>
    %293 = vector.extract_strided_slice %7 {offsets = [0, 6], sizes = [4, 1], strides = [1, 1]} : vector<4x16xf32> to vector<4x1xf32>
    %294 = vector.extract_strided_slice %233 {offsets = [2, 0], sizes = [1, 256], strides = [1, 1]} : vector<4x256xf32> to vector<1x256xf32>
    %295 = vector.broadcast %293 : vector<4x1xf32> to vector<4x256xf32>
    %296 = vector.broadcast %294 : vector<1x256xf32> to vector<4x256xf32>
    %297 = arith.mulf %295, %296 : vector<4x256xf32>
    %298 = arith.addf %292, %297 : vector<4x256xf32>
    %299 = vector.extract_strided_slice %7 {offsets = [0, 7], sizes = [4, 1], strides = [1, 1]} : vector<4x16xf32> to vector<4x1xf32>
    %300 = vector.extract_strided_slice %233 {offsets = [3, 0], sizes = [1, 256], strides = [1, 1]} : vector<4x256xf32> to vector<1x256xf32>
    %301 = vector.broadcast %299 : vector<4x1xf32> to vector<4x256xf32>
    %302 = vector.broadcast %300 : vector<1x256xf32> to vector<4x256xf32>
    %303 = arith.mulf %301, %302 : vector<4x256xf32>
    %304 = arith.addf %298, %303 : vector<4x256xf32>
    %305 = vector.extract_strided_slice %7 {offsets = [0, 8], sizes = [4, 1], strides = [1, 1]} : vector<4x16xf32> to vector<4x1xf32>
    %306 = vector.extract_strided_slice %245 {offsets = [0, 0], sizes = [1, 256], strides = [1, 1]} : vector<4x256xf32> to vector<1x256xf32>
    %307 = vector.broadcast %305 : vector<4x1xf32> to vector<4x256xf32>
    %308 = vector.broadcast %306 : vector<1x256xf32> to vector<4x256xf32>
    %309 = arith.mulf %307, %308 : vector<4x256xf32>
    %310 = arith.addf %304, %309 : vector<4x256xf32>
    %311 = vector.extract_strided_slice %7 {offsets = [0, 9], sizes = [4, 1], strides = [1, 1]} : vector<4x16xf32> to vector<4x1xf32>
    %312 = vector.extract_strided_slice %245 {offsets = [1, 0], sizes = [1, 256], strides = [1, 1]} : vector<4x256xf32> to vector<1x256xf32>
    %313 = vector.broadcast %311 : vector<4x1xf32> to vector<4x256xf32>
    %314 = vector.broadcast %312 : vector<1x256xf32> to vector<4x256xf32>
    %315 = arith.mulf %313, %314 : vector<4x256xf32>
    %316 = arith.addf %310, %315 : vector<4x256xf32>
    %317 = vector.extract_strided_slice %7 {offsets = [0, 10], sizes = [4, 1], strides = [1, 1]} : vector<4x16xf32> to vector<4x1xf32>
    %318 = vector.extract_strided_slice %245 {offsets = [2, 0], sizes = [1, 256], strides = [1, 1]} : vector<4x256xf32> to vector<1x256xf32>
    %319 = vector.broadcast %317 : vector<4x1xf32> to vector<4x256xf32>
    %320 = vector.broadcast %318 : vector<1x256xf32> to vector<4x256xf32>
    %321 = arith.mulf %319, %320 : vector<4x256xf32>
    %322 = arith.addf %316, %321 : vector<4x256xf32>
    %323 = vector.extract_strided_slice %7 {offsets = [0, 11], sizes = [4, 1], strides = [1, 1]} : vector<4x16xf32> to vector<4x1xf32>
    %324 = vector.extract_strided_slice %245 {offsets = [3, 0], sizes = [1, 256], strides = [1, 1]} : vector<4x256xf32> to vector<1x256xf32>
    %325 = vector.broadcast %323 : vector<4x1xf32> to vector<4x256xf32>
    %326 = vector.broadcast %324 : vector<1x256xf32> to vector<4x256xf32>
    %327 = arith.mulf %325, %326 : vector<4x256xf32>
    %328 = arith.addf %322, %327 : vector<4x256xf32>
    %329 = vector.extract_strided_slice %7 {offsets = [0, 12], sizes = [4, 1], strides = [1, 1]} : vector<4x16xf32> to vector<4x1xf32>
    %330 = vector.extract_strided_slice %257 {offsets = [0, 0], sizes = [1, 256], strides = [1, 1]} : vector<4x256xf32> to vector<1x256xf32>
    %331 = vector.broadcast %329 : vector<4x1xf32> to vector<4x256xf32>
    %332 = vector.broadcast %330 : vector<1x256xf32> to vector<4x256xf32>
    %333 = arith.mulf %331, %332 : vector<4x256xf32>
    %334 = arith.addf %328, %333 : vector<4x256xf32>
    %335 = vector.extract_strided_slice %7 {offsets = [0, 13], sizes = [4, 1], strides = [1, 1]} : vector<4x16xf32> to vector<4x1xf32>
    %336 = vector.extract_strided_slice %257 {offsets = [1, 0], sizes = [1, 256], strides = [1, 1]} : vector<4x256xf32> to vector<1x256xf32>
    %337 = vector.broadcast %335 : vector<4x1xf32> to vector<4x256xf32>
    %338 = vector.broadcast %336 : vector<1x256xf32> to vector<4x256xf32>
    %339 = arith.mulf %337, %338 : vector<4x256xf32>
    %340 = arith.addf %334, %339 : vector<4x256xf32>
    %341 = vector.extract_strided_slice %7 {offsets = [0, 14], sizes = [4, 1], strides = [1, 1]} : vector<4x16xf32> to vector<4x1xf32>
    %342 = vector.extract_strided_slice %257 {offsets = [2, 0], sizes = [1, 256], strides = [1, 1]} : vector<4x256xf32> to vector<1x256xf32>
    %343 = vector.broadcast %341 : vector<4x1xf32> to vector<4x256xf32>
    %344 = vector.broadcast %342 : vector<1x256xf32> to vector<4x256xf32>
    %345 = arith.mulf %343, %344 : vector<4x256xf32>
    %346 = arith.addf %340, %345 : vector<4x256xf32>
    %347 = vector.extract_strided_slice %7 {offsets = [0, 15], sizes = [4, 1], strides = [1, 1]} : vector<4x16xf32> to vector<4x1xf32>
    %348 = vector.extract_strided_slice %257 {offsets = [3, 0], sizes = [1, 256], strides = [1, 1]} : vector<4x256xf32> to vector<1x256xf32>
    %349 = vector.broadcast %347 : vector<4x1xf32> to vector<4x256xf32>
    %350 = vector.broadcast %348 : vector<1x256xf32> to vector<4x256xf32>
    %351 = arith.mulf %349, %350 : vector<4x256xf32>
    %352 = arith.addf %346, %351 : vector<4x256xf32>
    %353 = vector.broadcast %8 : vector<4x1xf32> to vector<4x256xf32>
    %354 = arith.addf %352, %353 : vector<4x256xf32>
    %cst_22 = arith.constant 0.000000e+00 : f32
    %355 = vector.broadcast %cst_22 : f32 to vector<4x256xf32>
    %356 = arith.maximumf %354, %355 : vector<4x256xf32>
    %357 = vector.broadcast %13 : vector<4x1xf32> to vector<4x256xf32>
    %358 = arith.mulf %357, %356 : vector<4x256xf32>
    %cst_23 = arith.constant dense<0.000000e+00> : vector<256xf32>
    %359 = vector.multi_reduction <add>, %358, %cst_23 [0] : vector<4x256xf32> to vector<256xf32>
    %360 = vector.shape_cast %359 : vector<256xf32> to vector<1x256xf32>
    %361 = arith.negf %360 : vector<1x256xf32>
    %362 = math.exp %361 : vector<1x256xf32>
    %cst_24 = arith.constant 1.000000e+00 : f32
    %363 = vector.broadcast %cst_24 : f32 to vector<1x256xf32>
    %364 = arith.addf %363, %362 : vector<1x256xf32>
    %365 = arith.divf %363, %364 : vector<1x256xf32>
    %366 = tpu.iota {dimensions = array<i32: 0>} : vector<256x64xi32>
    %367 = arith.sitofp %366 : vector<256x64xi32> to vector<256x64xf32>
    %368 = tpu.iota {dimensions = array<i32: 1>} : vector<256x64xi32>
    %369 = arith.sitofp %368 : vector<256x64xi32> to vector<256x64xf32>
    %cst_25 = arith.constant 5.000000e-01 : f32
    %370 = vector.broadcast %cst_25 : f32 to vector<256x64xf32>
    %371 = arith.addf %367, %370 : vector<256x64xf32>
    %cst_26 = arith.constant 1.600000e+01 : f32
    %372 = vector.broadcast %cst_26 : f32 to vector<256x64xf32>
    %373 = arith.divf %371, %372 : vector<256x64xf32>
    %374 = math.floor %373 : vector<256x64xf32>
    %cst_27 = arith.constant 1.600000e+01 : f32
    %375 = vector.broadcast %cst_27 : f32 to vector<256x64xf32>
    %376 = arith.mulf %374, %375 : vector<256x64xf32>
    %377 = arith.subf %367, %376 : vector<256x64xf32>
    %cst_28 = arith.constant 5.000000e-01 : f32
    %378 = vector.broadcast %cst_28 : f32 to vector<256x64xf32>
    %379 = arith.addf %374, %378 : vector<256x64xf32>
    %cst_29 = arith.constant 2.000000e+00 : f32
    %380 = vector.broadcast %cst_29 : f32 to vector<256x64xf32>
    %381 = arith.divf %379, %380 : vector<256x64xf32>
    %382 = math.floor %381 : vector<256x64xf32>
    %cst_30 = arith.constant 8.000000e+00 : f32
    %383 = vector.broadcast %cst_30 : f32 to vector<256x64xf32>
    %384 = arith.mulf %382, %383 : vector<256x64xf32>
    %cst_31 = arith.constant 5.000000e-01 : f32
    %385 = vector.broadcast %cst_31 : f32 to vector<256x64xf32>
    %386 = arith.addf %377, %385 : vector<256x64xf32>
    %cst_32 = arith.constant 2.000000e+00 : f32
    %387 = vector.broadcast %cst_32 : f32 to vector<256x64xf32>
    %388 = arith.divf %386, %387 : vector<256x64xf32>
    %389 = math.floor %388 : vector<256x64xf32>
    %390 = arith.addf %384, %389 : vector<256x64xf32>
    %391 = arith.subf %390, %369 : vector<256x64xf32>
    %392 = math.absf %391 : vector<256x64xf32>
    %cst_33 = arith.constant 5.000000e-01 : f32
    %393 = vector.broadcast %cst_33 : f32 to vector<256x64xf32>
    %394 = arith.cmpf olt, %392, %393 : vector<256x64xf32>
    %cst_34 = arith.constant 2.500000e-01 : f32
    %cst_35 = arith.constant 0.000000e+00 : f32
    %395 = vector.broadcast %cst_34 : f32 to vector<256x64xf32>
    %396 = vector.broadcast %cst_35 : f32 to vector<256x64xf32>
    %397 = arith.select %394, %395, %396 : vector<256x64xi1>, vector<256x64xf32>
    %398 = vector.shape_cast %365 : vector<1x256xf32> to vector<1x256xf32>
    %399 = vector.broadcast %398 : vector<1x256xf32> to vector<8x256xf32>
    %cst_36 = arith.constant dense<0.000000e+00> : vector<8x64xf32>
    %400 = tpu.matmul %399, %397, %cst_36 {dimension_numbers = #tpu.dot_dimension_numbers<[1], [0], [0], [1], [0, 0, 1, 1], [], []>} : vector<8x256xf32>, vector<256x64xf32>, vector<8x64xf32> -> vector<8x64xf32>
    %401 = vector.extract_strided_slice %400 {offsets = [0, 0], sizes = [1, 64], strides = [1, 1]} : vector<8x64xf32> to vector<1x64xf32>
    %c0_37 = arith.constant 0 : index
    %c0_38 = arith.constant 0 : index
    %c0_39 = arith.constant 0 : index
    %402 = vector.load %arg3[%c0_37, %c0_38, %c0_39] : memref<1x1x64xf32, #tpu.memory_space<vmem>>, vector<1x1x64xf32>
    %403 = vector.shape_cast %402 : vector<1x1x64xf32> to vector<1x64xf32>
    %404 = vector.shape_cast %401 : vector<1x64xf32> to vector<1x1x64xf32>
    tpu.vector_store %arg3[%c0_37, %c0_38, %c0_39], %404 {strides = array<i32>} : memref<1x1x64xf32, #tpu.memory_space<vmem>>, vector<1x1x64xf32>,
    return
  }
  func.func @transform_0(%arg0: i32) -> (i32, i32, i32) {
    %c0_i32 = arith.constant 0 : i32
    %c0_i32_0 = arith.constant 0 : i32
    %c0_i32_1 = arith.constant 0 : i32
    return %arg0, %c0_i32, %c0_i32_0 : i32, i32, i32
  }
  func.func @transform_1(%arg0: i32) -> (i32, i32) {
    %c0_i32 = arith.constant 0 : i32
    %c0_i32_0 = arith.constant 0 : i32
    %c0_i32_1 = arith.constant 0 : i32
    return %c0_i32, %c0_i32_0 : i32, i32
  }
  func.func @transform_2(%arg0: i32) -> (i32, i32, i32) {
    %c0_i32 = arith.constant 0 : i32
    %c0_i32_0 = arith.constant 0 : i32
    %c0_i32_1 = arith.constant 0 : i32
    return %arg0, %c0_i32, %c0_i32_0 : i32, i32, i32
  }
}

</mosaic_0001>

<bundles_post_ra>
// kernel: tpu_custom_call.1
= control target key start
LH: loop header
LB: loop body
LE: loop exit
PB: predicated region body
PF: predicated region fallthrough
CT: control target
= control target key end

     0   :  { %7 = vsyncpa [#allocation3], 0  ;;  %s2854_s0 = inlined_call_operand.hbm [shape: f32[2,4,256], index: 0, kind: input, shape index: {}]   ;;  %s2855_s1 = inlined_call_operand.hbm [shape: f32[4,56], index: 1, kind: input, shape index: {}]   ;;  %s2856_s2 = inlined_call_operand.hbm [shape: f32[2,1,64], index: 2, kind: output, shape index: {}]  }
   0x1   :  { %9 = vsyncpa [#allocation3 + $0x1], 0 }
   0x2   :  { %10 = vsyncpa [#allocation6], 0 }
   0x3   :  { %11 = vsyncpa [#allocation4], 0 }
   0x4   :  { %13 = vsyncpa [#allocation4 + $0x1], 0  ;;  %s2065_s9 = smov 0   ;;  %s2067_s10 = smov 0  }
   0x5   :  { %s2069_s11 = smov 0   ;;  %s2071_s12 = smov 0  }
   0x6 LB: > { %s2086_s13 = sadd.s32 4294967295, %s1984_s12   ;;  %s1618_s14 = sadd.s32 4294967294, %s1984_s12   ;;  %s1984_s12 = sphi %s2071_s12, %s2868_s12   ;;  %s1980_s11 = sphi %s2069_s11, %s2867_s11   ;;  %s1976_s10 = sphi %s2067_s10, %s2866_s10   ;;  %s1972_s9 = sphi %s2065_s9, %s2865_s9  }
   0x7   : > { %p39_p0 = scmp.ne.s32.totalorder %s1976_s10, %s1972_s9  ;;  %p40_p1 = scmp.eq.s32.totalorder %s2086_s13, 0 }
   0x8   : > { %p84_p2 = scmp.eq.s32.totalorder %s2086_s13, 1  ;;  %p90_p3 = scmp.eq.s32.totalorder %s1618_s14, 1 }
   0x9   : > { %p2095_p4 = por %p40_p1, %p39_p0  ;;  %p1619_p5 = scmp.ge.s32.totalorder %s1984_s12, 1 }
   0xa   : > { %p2100_p6 = por %p90_p3, %p39_p0  ;;  %p97_p7 = scmp.lt.s32.totalorder %s1984_s12, 3 }
   0xb   : > { %s109_s19 = sshll.u32 %s2855_s1, 4  ;;  %s1986_s21 = smov [#allocation5]   ;;  %s110_s19 = int_to_ptr.hbm [resolvable:$true] %s109_s19 }
   0xc   : > { %p2108_p8 = pnand %p1619_p5, %p97_p7  ;;  %s111_s22 = sshll.u32 %s1986_s21, 4  ;;  %s112_s22 = int_to_ptr.vmem [resolvable:$true] %s111_s22 }
   0xd   : > { %s2118_s23 = sadd.s32 1, %s1984_s12   ;;  %s26_s24 = sadd.s32 1, %s1980_s11 }
   0xe   : > { %p1673_p10 = pneg %p2108_p8  ;;  %s23_s25 = ssub.s32 %s1984_s12, %s2118_s23 }
   0xf   : > { %p24_p12 = scmp.eq.s32.totalorder %s23_s25, 0  ;;  %p33_p13 = scmp.ne.s32.totalorder %s1980_s11, %s1976_s10 }
  0x10   : > { %p1674_p11 = pnand %p1673_p10, %p40_p1  ;;  %p34_p0 = scmp.eq.s32.totalorder %s1984_s12, 0 }
  0x11   : > { %s2127_s26 = scalar_select %p24_p12, %s1980_s11, %s26_s24  }
  0x12   : > { %1676 = dma.hbm_to_vmem [thread:$0]  (!%p1674_p11), %s110_s19, 64, %s112_s22, [#allocation6]  }
  0x13   : > { %p2131_p3 = por %p84_p2, %p33_p13  ;;  %p1686_p5 = scmp.lt.s32.totalorder %s1984_s12, 2 }
  0x14   : > { %s122_s28 = sand.u32 1, %s1980_s11   ;;  %s1664_s29 = sshll.u32 %s1984_s12, 3 }
  0x15   : > { %p35_p7 = por %p34_p0, %p33_p13  ;;  %s1622_s30 = sshll.u32 %s122_s28, 3 }
  0x16   : > { %s131_s5 = scalar_lea.hbm %s2854_s0, %s1664_s29  ;;  %s126_s7 = scalar_lea.vmem [#allocation2], %s1622_s30 }
  0x17   : > { %s133_s6 = sshll.u32 %s131_s5, 4  ;;  %s135_s8 = sshll.u32 %s126_s7, 4  ;;  %s134_s6 = int_to_ptr.hbm [resolvable:$true] %s133_s6  ;;  %s136_s8 = int_to_ptr.vmem [resolvable:$true] %s135_s8 }
  0x18   : > { %p2141_p10 = pnand %p1686_p5, %p35_p7  ;;  %s123_s17 = scalar_lea.sflag [#allocation3], %s122_s28 }
  0x19   : > { %s1884_s18 = sshra.s32 %s134_s6, 4  ;;  %s1891_s24 = scalar_lea.hbm %s2854_s0, 16  ;;  %s1885_s18 = int_to_ptr.hbm [resolvable:$true] %s1884_s18 }
  0x1a   : > { %s1886_s19 = scalar_lea.hbm %s1885_s18, 8  ;;  %p1888_p11 = pneg %p2141_p10 }
  0x1b   : > { %p1887_p2 = scmp.ne.s32.totalorder %s1885_s18, %s1886_s19  ;;  %p1892_p0 = scmp.lt.s32.totalorder %s1885_s18, %s2854_s0 }
  0x1c   : > { %p1893_p5 = scmp.lt.s32.totalorder %s1891_s24, %s1886_s19 }
  0x1d   : > { %p1889_p12 = pnand %p1888_p11, %p1887_p2 }
  0x1e   : > { %p1894_p7 = por %p1893_p5, %p1892_p0 }
  0x1f   : > { %p1890_p13 = pneg %p1889_p12 }
  0x21   : > { %p1895_p9 = pnand %p1894_p7, %p1890_p13 }
  0x23   : > { %1898 = shalt.err (!%p1895_p9)
}
  0x24   : > { %1680 = dma.hbm_to_vmem [thread:$0]  (!%p2141_p10), %s134_s6, 128, %s136_s8, %s123_s17  }
  0x25   : > { %144 = sbr.rel (%p2108_p8) target bundleno = 816 (0x330), region = 28  ;;  %s2158_s28 = sand.u32 (!%p2108_p8), 1, %s1976_s10  }
  0x26   : > { %s1626_s30 = sshll.u32 (!%p2108_p8), %s2158_s28, 3  ;;  %s147_s3 = scalar_lea.sflag (!%p2108_p8), [#allocation3], %s2158_s28 }
  0x27   : > { %s2162_s4 = scalar_lea.vmem (!%p2108_p8), [#allocation2], %s1626_s30 }
  0x2a   : > { %1959 = dma.done.wait (%p2095_p4), %s147_s3, 128  }
  0x2b   : > { %1961 = vsyncadd (%p2095_p4), %s147_s3, 4294967168 }
  0x2c   : > { %1963 = dma.done.wait (%p40_p1), [#allocation6], 64  }
  0x2d   : > { %1965 = vsyncadd (%p40_p1), [#allocation6], 4294967232  ;;  %v1987_v0 = vmov 0   ;;  %v1988_v1 = vmov 2   ;;  %v1989_v2 = vmov 4   ;;  %v1990_v4 = vmov 1   ;;  %s1538_s14 = scalar_lea.hbm %s2856_s2, %s2086_s13 }
  0x2e   : > { %1785 = vset.pattern.permute.xlu0 %v1987_v0  ;;  %1787 = vset.pattern.permute.xlu1 %v1988_v1  ;;  %v2172_v3 = vld [vmem:[#allocation5] sm:$0xf]  ;;  %v1991_v5 = vmov 3   ;;  %v1992_v6 = vmov 43   ;;  %v1993_v7 = vmov 39   ;;  %v1994_v8 = vmov 5  }
  0x2f   : > { %1789 = vset.pattern.permute.xlu2 %v1989_v2  ;;  %210 = vperm.xlu0 %1785, %v2172_v3   ;;  %v1995_v9 = vmov 40   ;;  %v1996_v10 = vmov 44   ;;  %v1997_v11 = vmov 41   ;;  %v1998_v12 = vmov 8   ;;  %v176_v25 = vld [vmem:[%s2162_s4] sm:$0xff]  ;;  %s2012_s15 = smov 127  }
  0x30   : > { %237 = vperm.xlu1 %1787, %v2172_v3   ;;  %265 = vperm.xlu2 %1789, %v2172_v3   ;;  %v1999_v13 = vmov 6   ;;  %v2000_v14 = vmov 9   ;;  %v2001_v15 = vmov 7   ;;  %v2002_v16 = vmov 45   ;;  %s2013_s20 = smov 16   ;;  %s2014_s5 = smov 112  }
  0x31   : > { %v2003_v17 = vmov 10   ;;  %v2004_v18 = vmov 42   ;;  %v2005_v19 = vmov 11   ;;  %v2006_v20 = vmov 12   ;;  %s2016_s6 = smov 1   ;;  %s175_s17 = scalar_lea.vmem [#allocation7], %s2158_s28 }
  0x32   : > { %v2007_v21 = vmov 13   ;;  %v2008_v22 = vmov 46   ;;  %v2009_v23 = vmov 16   ;;  %v2010_v24 = vmov 15   ;;  %s1540_s18 = sshll.u32 %s175_s17, 4  ;;  %s1542_s19 = sshll.u32 %s1538_s14, 4  ;;  %s1541_s18 = int_to_ptr.vmem [resolvable:$true] %s1540_s18  ;;  %s1543_s19 = int_to_ptr.hbm [resolvable:$true] %s1542_s19 }
  0x33   : > { %v214_v28 = vperm.slane %v176_v25, 0  ;;  %v215_v29 = vperm.slane %v176_v25, 4  ;;  %v226_v30 = vperm.slane %v176_v25, 1  ;;  %v227_v31 = vperm.slane %v176_v25, 5  ;;  %s1530_s21 = scalar_lea.sflag [#allocation4], %s2158_s28  ;;  %s1928_s22 = sshra.s32 %s1543_s19, 4  ;;  %s1929_s22 = int_to_ptr.hbm [resolvable:$true] %s1928_s22 }
  0x34   : > { %v240_v32 = vperm.slane %v176_v25, 2  ;;  %v241_v33 = vperm.slane %v176_v25, 6  ;;  %v254_v34 = vperm.slane %v176_v25, 3  ;;  %v255_v35 = vperm.slane %v176_v25, 7  ;;  %s1930_s24 = scalar_lea.hbm %s1929_s22, 1  ;;  %s1934_s29 = scalar_lea.hbm %s2856_s2, 2 }
  0x35   : > { %v218_v36 = vperm.slane %v214_v28, 0  ;;  %v219_v37 = vperm.slane %v215_v29, 0  ;;  %v230_v38 = vperm.slane %v226_v30, 1  ;;  %v231_v39 = vperm.slane %v227_v31, 1  ;;  %p1931_p1 = scmp.ne.s32.totalorder %s1929_s22, %s1930_s24  ;;  %p1935_p9 = scmp.lt.s32.totalorder %s1929_s22, %s2856_s2 }
  0x36   : > { %v244_v40 = vperm.slane %v240_v32, 2  ;;  %v245_v41 = vperm.slane %v241_v33, 2  ;;  %v2011_v42 = vmov 14   ;;  %v258_v43 = vperm.slane %v254_v34, 3  ;;  %p1936_p10 = scmp.lt.s32.totalorder %s1934_s29, %s1930_s24 }
  0x37   : > { %1786 = vset.pattern.permute.xlu0 %v1990_v4  ;;  %v259_v44 = vperm.slane %v255_v35, 3  ;;  %v2015_v0 = vmov 21   ;;  %v2017_v1 = vmov 17   ;;  %v2018_v2 = vmov 18   ;;  %p1932_p4 = pnand %p1931_p1, %p2131_p3 }
  0x38   : > { %1788 = vset.pattern.permute.xlu1 %v1991_v5  ;;  %223 = vperm.xlu0 %1786, %v2172_v3   ;;  %v2019_v4 = vmov 19   ;;  %v2020_v5 = vmov 20   ;;  %v2025_v32 = vmov 22   ;;  %v2026_v33 = vmov 23   ;;  %p1937_p2 = por %p1936_p10, %p1935_p9 }
  0x39   : > { %251 = vperm.xlu1 %1788, %v2172_v3   ;;  %1791 = vset.pattern.permute.xlu2 %v1992_v6  ;;  %vm818_vm14 = vcmask 1043456   ;;  %p1933_p8 = pneg %p1932_p4 }
  0x3a   : > { %305 = vperm.xlu2 %1791, %v2172_v3  }
  0x3b   : > { %p1938_p11 = pnand %p1937_p2, %p1933_p8 }
  0x40   : > { %1792 = vset.pattern.permute.xlu0 %v1995_v9 }
  0x41   : > { %1790 = vset.pattern.permute.xlu1 %v1993_v7  ;;  %321 = vperm.xlu0 %1792, %v2172_v3  }
  0x42   : > { %299 = vperm.xlu1 %1790, %v2172_v3   ;;  %1794 = vset.pattern.permute.xlu2 %v1994_v8 }
  0x43   : > { %387 = vperm.xlu2 %1794, %v2172_v3  }
  0x49   : > { %1798 = vset.pattern.permute.xlu0 %v1998_v12 }
  0x4a   : > { %1793 = vset.pattern.permute.xlu1 %v1996_v10  ;;  %415 = vperm.xlu0 %1798, %v2172_v3  }
  0x4b   : > { %327 = vperm.xlu1 %1793, %v2172_v3   ;;  %1797 = vset.pattern.permute.xlu2 %v1997_v11 }
  0x4c   : > { %343 = vperm.xlu2 %1797, %v2172_v3  }
  0x52   : > { %1804 = vset.pattern.permute.xlu0 %v2006_v20  ;;  %v2022_v20 = vmov 16.0  }
  0x53   : > { %1795 = vset.pattern.permute.xlu1 %v1999_v13  ;;  %455 = vperm.xlu0 %1804, %v2172_v3   ;;  %1842 = vrcp.f32 %v2022_v20  ;;  %v2031_v20 = vmov 53  }
  0x54   : > { %395 = vperm.xlu1 %1795, %v2172_v3   ;;  %1800 = vset.pattern.permute.xlu2 %v2000_v14 }
  0x55   : > { %425 = vperm.xlu2 %1800, %v2172_v3  }
  0x5b   : > { %1809 = vset.pattern.permute.xlu0 %v2009_v23  ;;  %v1843_v23 = vpop.eup %1842 }
  0x5c   : > { %1796 = vset.pattern.permute.xlu1 %v2001_v15  ;;  %495 = vperm.xlu0 %1809, %v2172_v3   ;;  %vm190_vm0 = vweird.f32 %v1843_v23 }
  0x5d   : > { %405 = vperm.xlu1 %1796, %v2172_v3   ;;  %1803 = vset.pattern.permute.xlu2 %v2004_v18 }
  0x5e   : > { %365 = vperm.xlu2 %1803, %v2172_v3  }
  0x64   : > { %1814 = vset.pattern.permute.xlu0 %v2015_v0 }
  0x65   : > { %1799 = vset.pattern.permute.xlu1 %v2002_v16  ;;  %v2021_v16 = vmov 51  }
  0x66   : > { %349 = vperm.xlu1 %1799, %v2172_v3   ;;  %1806 = vset.pattern.permute.xlu2 %v2007_v21  ;;  %v2023_v21 = vmov 47  }
  0x67   : > { %465 = vperm.xlu2 %1806, %v2172_v3  }
  0x6e   : > { %1801 = vset.pattern.permute.xlu1 %v2003_v17 }
  0x6f   : > { %435 = vperm.xlu1 %1801, %v2172_v3   ;;  %1808 = vset.pattern.permute.xlu2 %v2010_v24 }
  0x77   : > { %1802 = vset.pattern.permute.xlu1 %v2005_v19 }
  0x78   : > { %445 = vperm.xlu1 %1802, %v2172_v3  }
  0x80   : > { %1805 = vset.pattern.permute.xlu1 %v2008_v22  ;;  %v2024_v22 = vmov 48  }
  0x81   : > { %371 = vperm.xlu1 %1805, %v2172_v3  }
  0x89   : > { %1807 = vset.pattern.permute.xlu1 %v2011_v42 }
  0x8a   : > { %v266_v59 = vpop.permute.xlu2 %265 }
  0x94   : > { %v2219_v6 = vpop.permute.xlu2 %305 }
  0x9d   : > { %v2225_v8 = vpop.permute.xlu2 %387 }
  0xa1   : > { %v211_v26 = vpop.permute.xlu0 %210 }
  0xa2   : > { %v238_v27 = vpop.permute.xlu1 %237  ;;  %v220_v47 = vmul.f32 %v218_v36, %v211_v26  ;;  %v221_v48 = vmul.f32 %v219_v37, %v211_v26  ;;  %v178_v26 = vlaneseq }
  0xa3   : > { %v246_v51 = vmul.f32 %v244_v40, %v238_v27  ;;  %v247_v52 = vmul.f32 %v245_v41, %v238_v27  ;;  %v186_v27 = vmul.f32 16.0, %v1843_v23 }
  0xa4   : > { %v2259_v29 = vand.u32 127, %v178_v26 }
  0xa5   : > { %v187_v30 = vsub.f32 1.0, %v186_v27 }
  0xa6   : > { %v2233_v10 = vpop.permute.xlu2 %343  ;;  %v2264_v34 = vadd.s32 128, %v2259_v29  ;;  %vm274_vm1 = vcmp.lt.s32.totalorder %v2259_v29, 16  ;;  %vm281_vm4 = vcmp.lt.s32.totalorder %v2259_v29, 127  ;;  %vm288_vm7 = vcmp.lt.s32.totalorder %v2259_v29, 112 }
  0xa7   : > { %v188_v35 = vmul.f32 %v1843_v23, %v187_v30  ;;  %vm295_vm10 = vcmp.lt.s32.totalorder %v2259_v29, 1 }
  0xa9   : > { %v189_v40 = vadd.f32 %v1843_v23, %v188_v35 }
  0xaa   : > { %v224_v45 = vpop.permute.xlu0 %223 }
  0xab   : > { %v252_v46 = vpop.permute.xlu1 %251  ;;  %v232_v49 = vmul.f32 %v230_v38, %v224_v45  ;;  %v233_v50 = vmul.f32 %v231_v39, %v224_v45  ;;  %v2273_v38 = vcvt.s32.f32 %v2259_v29  ;;  %v182_v39 = vcvt.s32.f32 %v2264_v34 }
  0xac   : > { %v260_v55 = vmul.f32 %v258_v43, %v252_v46  ;;  %v261_v56 = vmul.f32 %v259_v44, %v252_v46  ;;  %v2279_v44 = vsel %vm190_vm0, %v1843_v23, %v189_v40 }
  0xad   : > { %v234_v53 = vadd.f32 %v232_v49, %v220_v47  ;;  %v235_v54 = vadd.f32 %v233_v50, %v221_v48  ;;  %v183_v42 = vadd.f32 0.5, %v2273_v38  ;;  %v184_v43 = vadd.f32 0.5, %v182_v39 }
  0xae   : > { %v2027_v48 = vmov 52   ;;  %v2028_v49 = vmov 49  }
  0xaf   : > { %v248_v57 = vadd.f32 %v246_v51, %v234_v53  ;;  %v249_v58 = vadd.f32 %v247_v52, %v235_v54  ;;  %v2237_v12 = vpop.permute.xlu2 %425  ;;  %v192_v45 = vmul.f32 %v2279_v44, %v183_v42  ;;  %v193_v47 = vmul.f32 %v2279_v44, %v184_v43 }
  0xb0   : > { %v2029_v51 = vmov 25  }
  0xb1   : > { %v262_v60 = vadd.f32 %v260_v55, %v248_v57  ;;  %v263_v61 = vadd.f32 %v261_v56, %v249_v58  ;;  %v2293_v54 = vfloor.f32 %v192_v45  ;;  %v2297_v57 = vfloor.f32 %v193_v47 }
  0xb3   : > { %v2198_v62 = vadd.f32 %v266_v59, %v262_v60  ;;  %v2200_v63 = vadd.f32 %v266_v59, %v263_v61  ;;  %v2248_v18 = vpop.permute.xlu0 %321  ;;  %vm200_vm2 = vcmp.lt.f32.partialorder %v2293_v54, 0.5  ;;  %vm201_vm3 = vcmp.lt.f32.partialorder %v2297_v57, 0.5 }
  0xb4   : > { %v2221_v7 = vpop.permute.xlu1 %299  ;;  %vm202_vm8 = vcmp.gt.f32.partialorder %v2293_v54, 14.5  ;;  %vm203_vm9 = vcmp.gt.f32.partialorder %v2297_v57, 14.5 }
  0xb5   : > { %279 = vrot.lane.b32.xlu0 %v2200_v63, %s2012_s15  ;;  %272 = vrot.lane.b32.xlu1 %v2200_v63, %s2013_s20 }
  0xb6   : > { %270 = vrot.lane.b32.xlu2 %v2198_v62, %s2013_s20 }
  0xb8   : > { %v2241_v14 = vpop.permute.xlu2 %365 }
  0xbc   : > { %v2254_v25 = vpop.permute.xlu0 %415 }
  0xbd   : > { %286 = vrot.lane.b32.xlu0 %v2200_v63, %s2014_s5  ;;  %475 = vperm.xlu1 %1807, %v2172_v3   ;;  %v2229_v9 = vpop.permute.xlu1 %327 }
  0xbe   : > { %485 = vperm.xlu2 %1808, %v2172_v3  }
  0xc1   : > { %v2246_v17 = vpop.permute.xlu2 %465 }
  0xc5   : > { %293 = vrot.lane.b32.xlu0 %v2200_v63, %s2016_s6  ;;  %1810 = vset.pattern.permute.xlu1 %v2017_v1  ;;  %v2268_v36 = vpop.permute.xlu0 %455  ;;  %v196_v1 = vmul.f32 16.0, %v2293_v54 }
  0xc6   : > { %1811 = vset.pattern.permute.xlu2 %v2018_v2  ;;  %505 = vperm.xlu1 %1810, %v2172_v3   ;;  %v2235_v11 = vpop.permute.xlu1 %395 }
  0xc7   : > { %515 = vperm.xlu2 %1811, %v2172_v3   ;;  %v2316_v23 = vsub.f32 %v2273_v38, %v196_v1 }
  0xc9   : > { %vm206_vm5 = vcmp.gt.f32.partialorder %v2316_v23, 14.5  ;;  %vm204_vm11 = vcmp.lt.f32.partialorder %v2316_v23, 0.5 }
  0xcd   : > { %545 = vperm.xlu0 %1814, %v2172_v3  }
  0xce   : > { %1812 = vset.pattern.permute.xlu1 %v2019_v4  ;;  %v2283_v46 = vpop.permute.xlu0 %495 }
  0xcf   : > { %1813 = vset.pattern.permute.xlu2 %v2020_v5  ;;  %525 = vperm.xlu1 %1812, %v2172_v3   ;;  %v2239_v13 = vpop.permute.xlu1 %405  ;;  %v197_v5 = vmul.f32 16.0, %v2297_v57 }
  0xd0   : > { %535 = vperm.xlu2 %1813, %v2172_v3  }
  0xd1   : > { %v2322_v34 = vsub.f32 %v182_v39, %v197_v5  ;;  %v2035_v5 = vmov 50  }
  0xd3   : > { %vm207_vm6 = vcmp.gt.f32.partialorder %v2322_v34, 14.5  ;;  %vm205_vm12 = vcmp.lt.f32.partialorder %v2322_v34, 0.5 }
  0xd5   : > { %1818 = vset.pattern.permute.xlu0 %v2027_v48 }
  0xd6   : > { %599 = vperm.xlu0 %1818, %v2172_v3  }
  0xd7   : > { %1815 = vset.pattern.permute.xlu1 %v2023_v21 }
  0xd8   : > { %277 = vrot.lane.b32.xlu2 %v2198_v62, %s2012_s15  ;;  %v2243_v15 = vpop.permute.xlu1 %349  ;;  %575 = vperm.xlu1 %1815, %v2172_v3  }
  0xd9   : > { %1816 = vset.pattern.permute.xlu2 %v2021_v16 }
  0xe0   : > { %284 = vrot.lane.b32.xlu2 %v2198_v62, %s2014_s5  ;;  %1819 = vset.pattern.permute.xlu1 %v2025_v32 }
  0xe1   : > { %v2250_v19 = vpop.permute.xlu1 %435  ;;  %647 = vperm.xlu1 %1819, %v2172_v3  }
  0xe8   : > { %291 = vrot.lane.b32.xlu2 %v2198_v62, %s2016_s6 }
  0xe9   : > { %1822 = vset.pattern.permute.xlu1 %v2028_v49 }
  0xea   : > { %v2256_v28 = vpop.permute.xlu1 %445  ;;  %611 = vperm.xlu1 %1822, %v2172_v3  }
  0xf0   : > { %581 = vperm.xlu2 %1816, %v2172_v3  }
  0xf2   : > { %1824 = vset.pattern.permute.xlu1 %v2031_v20 }
  0xf3   : > { %v2270_v37 = vpop.permute.xlu1 %371  ;;  %617 = vperm.xlu1 %1824, %v2172_v3  }
  0xf8   : > { %1817 = vset.pattern.permute.xlu2 %v2024_v22 }
  0xf9   : > { %593 = vperm.xlu2 %1817, %v2172_v3  }
 0x101   : > { %1820 = vset.pattern.permute.xlu2 %v2026_v33 }
 0x102   : > { %655 = vperm.xlu2 %1820, %v2172_v3  }
 0x10a   : > { %1823 = vset.pattern.permute.xlu2 %v2029_v51 }
 0x10b   : > { %675 = vperm.xlu2 %1823, %v2172_v3  }
 0x110   : > { %v271_v24 = vpop.permute.xlu2 %270 }
 0x118   : > { %v2261_v31 = vpop.permute.xlu2 %485 }
 0x121   : > { %v2276_v41 = vpop.permute.xlu2 %515 }
 0x127   : > { %v273_v50 = vpop.permute.xlu1 %272  ;;  %v280_v16 = vpop.permute.xlu0 %279 }
 0x128   : > { %v275_v52 = vsel %vm274_vm1, %v271_v24, %v273_v50  ;;  %v276_v53 = vsel %vm274_vm1, %v273_v50, %v271_v24 }
 0x129   : > { %v302_v55 = vmul.f32 %v2221_v7, %v276_v53  ;;  %v303_v56 = vmul.f32 %v2221_v7, %v275_v52  ;;  %v2030_v7 = vmov 24  }
 0x12a   : > { %v2299_v58 = vpop.permute.xlu2 %535  ;;  %1821 = vset.pattern.permute.xlu0 %v2030_v7 }
 0x12b   : > { %v308_v59 = vadd.f32 %v2219_v6, %v302_v55  ;;  %v309_v60 = vadd.f32 %v2219_v6, %v303_v56  ;;  %v2032_v6 = vmov 26   ;;  %665 = vperm.xlu0 %1821, %v2172_v3  }
 0x12c   : > { %1825 = vset.pattern.permute.xlu2 %v2032_v6 }
 0x12d   : > { %v310_v61 = vadd.f32 %v308_v59, %v2198_v62  ;;  %v311_v0 = vadd.f32 %v309_v60, %v2200_v63  ;;  %685 = vperm.xlu2 %1825, %v2172_v3  }
 0x12f   : > { %v312_v2 = vmax.f32 %v310_v61, 0.0  ;;  %v313_v4 = vmax.f32 %v311_v0, 0.0  ;;  %v287_v59 = vpop.permute.xlu0 %286  ;;  %v2033_v0 = vmov 27  }
 0x131   : > { %v318_v21 = vsel %vm200_vm2, %v2198_v62, %v312_v2  ;;  %v319_v22 = vsel %vm201_vm3, %v2200_v63, %v313_v4  ;;  %v2034_v4 = vmov 28  }
 0x132   : > { %v390_v24 = vperm.slane %v318_v21, 0  ;;  %v391_v27 = vperm.slane %v319_v22, 0  ;;  %v398_v30 = vperm.slane %v318_v21, 1  ;;  %v399_v32 = vperm.slane %v319_v22, 1  ;;  %v278_v33 = vpop.permute.xlu2 %277  ;;  %1827 = vset.pattern.permute.xlu1 %v2034_v4 }
 0x133   : > { %v282_v45 = vsel %vm281_vm4, %v278_v33, %v280_v16  ;;  %v283_v47 = vsel %vm281_vm4, %v280_v16, %v278_v33  ;;  %v408_v48 = vperm.slane %v318_v21, 2  ;;  %v409_v50 = vperm.slane %v319_v22, 2  ;;  %1826 = vset.pattern.permute.xlu0 %v2033_v0  ;;  %705 = vperm.xlu1 %1827, %v2172_v3  }
 0x134   : > { %v392_v35 = vmul.f32 %v390_v24, %v2225_v8  ;;  %v400_v40 = vmul.f32 %v398_v30, %v2235_v11  ;;  %v393_v42 = vmul.f32 %v391_v27, %v2225_v8  ;;  %v401_v43 = vmul.f32 %v399_v32, %v2235_v11  ;;  %695 = vperm.xlu0 %1826, %v2172_v3  }
 0x135   : > { %v324_v39 = vmul.f32 %v2248_v18, %v282_v45  ;;  %v325_v49 = vmul.f32 %v2248_v18, %v283_v47  ;;  %v418_v51 = vperm.slane %v318_v21, 3  ;;  %v419_v8 = vperm.slane %v319_v22, 3  ;;  %1828 = vset.pattern.permute.xlu2 %v2035_v5 }
 0x136   : > { %v402_v53 = vadd.f32 %v400_v40, %v392_v35  ;;  %v403_v55 = vadd.f32 %v401_v43, %v393_v42  ;;  %v410_v56 = vmul.f32 %v408_v48, %v2239_v13  ;;  %v411_v1 = vmul.f32 %v409_v50, %v2239_v13  ;;  %629 = vperm.xlu2 %1828, %v2172_v3  }
 0x137   : > { %v330_v11 = vadd.f32 %v2229_v9, %v324_v39  ;;  %v331_v52 = vadd.f32 %v2229_v9, %v325_v49  ;;  %v420_v22 = vmul.f32 %v418_v51, %v2254_v25  ;;  %v421_v24 = vmul.f32 %v419_v8, %v2254_v25 }
 0x138   : > { %v412_v13 = vadd.f32 %v410_v56, %v402_v53  ;;  %v413_v21 = vadd.f32 %v411_v1, %v403_v55 }
 0x139   : > { %v332_v18 = vadd.f32 %v330_v11, %v2198_v62  ;;  %v333_v60 = vadd.f32 %v331_v52, %v2200_v63  ;;  %v476_v11 = vpop.permute.xlu1 %475 }
 0x13a   : > { %v285_v61 = vpop.permute.xlu2 %284  ;;  %v422_v48 = vadd.f32 %v420_v22, %v412_v13  ;;  %v423_v39 = vadd.f32 %v421_v24, %v413_v21 }
 0x13b   : > { %v289_v9 = vsel %vm288_vm7, %v285_v61, %v287_v59  ;;  %v290_v2 = vsel %vm288_vm7, %v287_v59, %v285_v61  ;;  %v334_v7 = vmax.f32 %v332_v18, 0.0  ;;  %v335_v16 = vmax.f32 %v333_v60, 0.0  ;;  %v294_v60 = vpop.permute.xlu0 %293 }
 0x13c   : > { %v346_v20 = vmul.f32 %v2233_v10, %v289_v9  ;;  %v347_v6 = vmul.f32 %v2233_v10, %v290_v2 }
 0x13d   : > { %v340_v27 = vsel %vm206_vm5, %v2198_v62, %v334_v7  ;;  %v341_v10 = vsel %vm207_vm6, %v2200_v63, %v335_v16 }
 0x13e   : > { %v352_v30 = vadd.f32 %v2243_v15, %v346_v20  ;;  %v353_v32 = vadd.f32 %v2243_v15, %v347_v6  ;;  %v428_v33 = vperm.slane %v340_v27, 0  ;;  %v429_v35 = vperm.slane %v341_v10, 0 }
 0x13f   : > { %v438_v40 = vperm.slane %v340_v27, 1  ;;  %v439_v42 = vperm.slane %v341_v10, 1  ;;  %v448_v45 = vperm.slane %v340_v27, 2  ;;  %v449_v47 = vperm.slane %v341_v10, 2 }
 0x140   : > { %v354_v25 = vadd.f32 %v352_v30, %v2198_v62  ;;  %v355_v43 = vadd.f32 %v353_v32, %v2200_v63  ;;  %v430_v49 = vmul.f32 %v428_v33, %v2237_v12  ;;  %v431_v50 = vmul.f32 %v429_v35, %v2237_v12 }
 0x141   : > { %v440_v15 = vmul.f32 %v438_v40, %v2250_v19  ;;  %v441_v52 = vmul.f32 %v439_v42, %v2250_v19  ;;  %v458_v59 = vperm.slane %v340_v27, 3  ;;  %v459_v18 = vperm.slane %v341_v10, 3 }
 0x142   : > { %v356_v51 = vmax.f32 %v354_v25, 0.0  ;;  %v357_v8 = vmax.f32 %v355_v43, 0.0  ;;  %v292_v53 = vpop.permute.xlu2 %291  ;;  %v432_v55 = vadd.f32 %v430_v49, %v422_v48  ;;  %v433_v56 = vadd.f32 %v431_v50, %v423_v39 }
 0x143   : > { %v450_v0 = vmul.f32 %v448_v45, %v2256_v28  ;;  %v451_v1 = vmul.f32 %v449_v47, %v2256_v28  ;;  %v296_v2 = vsel %vm295_vm10, %v292_v53, %v294_v60  ;;  %v297_v4 = vsel %vm295_vm10, %v294_v60, %v292_v53  ;;  %v506_v47 = vpop.permute.xlu1 %505 }
 0x144   : > { %v362_v61 = vsel %vm202_vm8, %v2198_v62, %v356_v51  ;;  %v363_v12 = vsel %vm203_vm9, %v2200_v63, %v357_v8  ;;  %v442_v9 = vadd.f32 %v440_v15, %v432_v55  ;;  %v443_v19 = vadd.f32 %v441_v52, %v433_v56 }
 0x145   : > { %v468_v5 = vperm.slane %v362_v61, 0  ;;  %v469_v7 = vperm.slane %v363_v12, 0  ;;  %v478_v16 = vperm.slane %v362_v61, 1  ;;  %v479_v20 = vperm.slane %v363_v12, 1 }
 0x146   : > { %v452_v6 = vadd.f32 %v450_v0, %v442_v9  ;;  %v453_v13 = vadd.f32 %v451_v1, %v443_v19  ;;  %v460_v21 = vmul.f32 %v458_v59, %v2268_v36  ;;  %v461_v22 = vmul.f32 %v459_v18, %v2268_v36 }
 0x147   : > { %v470_v28 = vmul.f32 %v468_v5, %v2246_v17  ;;  %v471_v24 = vmul.f32 %v469_v7, %v2246_v17  ;;  %v488_v30 = vperm.slane %v362_v61, 2  ;;  %v489_v32 = vperm.slane %v363_v12, 2 }
 0x148   : > { %v462_v27 = vadd.f32 %v460_v21, %v452_v6  ;;  %v463_v10 = vadd.f32 %v461_v22, %v453_v13  ;;  %v480_v33 = vmul.f32 %v478_v16, %v476_v11  ;;  %v481_v35 = vmul.f32 %v479_v20, %v476_v11 }
 0x149   : > { %v368_v40 = vmul.f32 %v2241_v14, %v297_v4  ;;  %v369_v42 = vmul.f32 %v2241_v14, %v296_v2  ;;  %v498_v48 = vperm.slane %v362_v61, 3  ;;  %v499_v39 = vperm.slane %v363_v12, 3 }
 0x14a   : > { %v472_v25 = vadd.f32 %v470_v28, %v462_v27  ;;  %v473_v43 = vadd.f32 %v471_v24, %v463_v10  ;;  %v2036_v17 = vmov 54   ;;  %v490_v51 = vmul.f32 %v488_v30, %v2261_v31 }
 0x14b   : > { %v374_v45 = vadd.f32 %v2270_v37, %v368_v40  ;;  %v375_v36 = vadd.f32 %v2270_v37, %v369_v42  ;;  %1830 = vset.pattern.permute.xlu1 %v2036_v17  ;;  %v491_v8 = vmul.f32 %v489_v32, %v2261_v31  ;;  %v2037_v11 = vmov 30   ;;  %v526_v7 = vpop.permute.xlu1 %525  ;;  %v546_v32 = vpop.permute.xlu0 %545 }
 0x14c   : > { %v482_v49 = vadd.f32 %v480_v33, %v472_v25  ;;  %v483_v50 = vadd.f32 %v481_v35, %v473_v43  ;;  %1831 = vset.pattern.permute.xlu2 %v2037_v11  ;;  %v500_v56 = vmul.f32 %v498_v48, %v2283_v46  ;;  %v501_v59 = vmul.f32 %v499_v39, %v2283_v46  ;;  %v582_v17 = vpop.permute.xlu2 %581 }
 0x14d   : > { %v376_v14 = vadd.f32 %v374_v45, %v2198_v62  ;;  %v377_v15 = vadd.f32 %v375_v36, %v2200_v63  ;;  %v2040_v25 = vmov 33   ;;  %v2041_v43 = vmov 34  }
 0x14e   : > { %v492_v52 = vadd.f32 %v490_v51, %v482_v49  ;;  %v493_v53 = vadd.f32 %v491_v8, %v483_v50  ;;  %v2042_v45 = vmov 32   ;;  %v2043_v36 = vmov 38  }
 0x14f   : > { %v378_v37 = vmax.f32 %v376_v14, 0.0  ;;  %v379_v55 = vmax.f32 %v377_v15, 0.0  ;;  %v2045_v48 = vmov 35   ;;  %v2046_v39 = vmov 37  }
 0x150   : > { %v502_v60 = vadd.f32 %v500_v56, %v492_v52  ;;  %v503_v61 = vadd.f32 %v501_v59, %v493_v53  ;;  %v2047_v49 = vmov 36  }
 0x151   : > { %v384_v31 = vsel %vm204_vm11, %v2198_v62, %v378_v37  ;;  %v385_v18 = vsel %vm205_vm12, %v2200_v63, %v379_v55 }
 0x152   : > { %v508_v12 = vperm.slane %v384_v31, 0  ;;  %v509_v0 = vperm.slane %v385_v18, 0  ;;  %v518_v1 = vperm.slane %v384_v31, 1  ;;  %v519_v9 = vperm.slane %v385_v18, 1 }
 0x153   : > { %v528_v4 = vperm.slane %v384_v31, 2  ;;  %v529_v5 = vperm.slane %v385_v18, 2  ;;  %v538_v46 = vperm.slane %v384_v31, 3  ;;  %v539_v16 = vperm.slane %v385_v18, 3  ;;  %v576_v51 = vpop.permute.xlu1 %575  ;;  %v600_v56 = vpop.permute.xlu0 %599 }
 0x154   : > { %v510_v19 = vmul.f32 %v508_v12, %v506_v47  ;;  %v511_v2 = vmul.f32 %v509_v0, %v506_v47  ;;  %v520_v62 = vmul.f32 %v518_v1, %v2276_v41  ;;  %v521_v13 = vmul.f32 %v519_v9, %v2276_v41  ;;  %v594_v50 = vpop.permute.xlu2 %593 }
 0x155   : > { %v530_v22 = vmul.f32 %v528_v4, %v526_v7  ;;  %v531_v28 = vmul.f32 %v529_v5, %v526_v7  ;;  %v540_v10 = vmul.f32 %v538_v46, %v2299_v58  ;;  %v541_v30 = vmul.f32 %v539_v16, %v2299_v58 }
 0x156   : > { %v512_v20 = vadd.f32 %v510_v19, %v502_v60  ;;  %v513_v6 = vadd.f32 %v511_v2, %v503_v61  ;;  %v2038_v41 = vmov 29   ;;  %v2039_v58 = vmov 31  }
 0x157   : > { %1829 = vset.pattern.permute.xlu0 %v2038_v41  ;;  %v2044_v47 = vmov 55  }
 0x158   : > { %v522_v63 = vadd.f32 %v520_v62, %v512_v20  ;;  %v523_v21 = vadd.f32 %v521_v13, %v513_v6 }
 0x15a   : > { %v532_v24 = vadd.f32 %v530_v22, %v522_v63  ;;  %v533_v27 = vadd.f32 %v531_v28, %v523_v21 }
 0x15b   : > { %v648_v11 = vpop.permute.xlu1 %647 }
 0x15c   : > { %v542_v33 = vadd.f32 %v540_v10, %v532_v24  ;;  %v543_v35 = vadd.f32 %v541_v30, %v533_v27  ;;  %v656_v8 = vpop.permute.xlu2 %655 }
 0x15e   : > { %v2409_v40 = vadd.f32 %v546_v32, %v542_v33  ;;  %v2411_v42 = vadd.f32 %v546_v32, %v543_v35  ;;  %v2472_v35 = vshrl.u32 %v178_v26, 7 }
 0x160   : > { %556 = vrot.lane.b32.xlu0 %v2409_v40, %s2012_s15  ;;  %550 = vrot.lane.b32.xlu1 %v2409_v40, %s2013_s20 }
 0x161   : > { %552 = vrot.lane.b32.xlu2 %v2411_v42, %s2013_s20 }
 0x163   : > { %v2441_v15 = vpop.permute.xlu1 %611 }
 0x165   : > { %v676_v14 = vpop.permute.xlu2 %675 }
 0x168   : > { %635 = vperm.xlu1 %1830, %v2172_v3   ;;  %715 = vperm.xlu0 %1829, %v2172_v3  }
 0x169   : > { %725 = vperm.xlu2 %1831, %v2172_v3  }
 0x16b   : > { %v2445_v53 = vpop.permute.xlu1 %617 }
 0x170   : > { %1832 = vset.pattern.permute.xlu1 %v2039_v58  ;;  %1834 = vset.pattern.permute.xlu0 %v2040_v25 }
 0x171   : > { %564 = vrot.lane.b32.xlu2 %v2411_v42, %s2014_s5  ;;  %735 = vperm.xlu1 %1832, %v2172_v3  }
 0x172   : > { %755 = vperm.xlu0 %1834, %v2172_v3   ;;  %1833 = vset.pattern.permute.xlu2 %v2042_v45 }
 0x179   : > { %570 = vrot.lane.b32.xlu2 %v2411_v42, %s2016_s6  ;;  %558 = vrot.lane.b32.xlu1 %v2411_v42, %s2012_s15 }
 0x17a   : > { %1835 = vset.pattern.permute.xlu1 %v2041_v43  ;;  %1839 = vset.pattern.permute.xlu0 %v2043_v36 }
 0x17b   : > { %805 = vperm.xlu0 %1839, %v2172_v3  }
 0x181   : > { %562 = vrot.lane.b32.xlu1 %v2409_v40, %s2014_s5  ;;  %745 = vperm.xlu2 %1833, %v2172_v3  }
 0x183   : > { %1841 = vset.pattern.permute.xlu0 %v2044_v47 }
 0x187   : > { %v2443_v52 = vpop.permute.xlu2 %685 }
 0x189   : > { %568 = vrot.lane.b32.xlu1 %v2409_v40, %s2016_s6  ;;  %1836 = vset.pattern.permute.xlu2 %v2045_v48 }
 0x18a   : > { %775 = vperm.xlu2 %1836, %v2172_v3  }
 0x190   : > { %v2447_v37 = vpop.permute.xlu2 %629 }
 0x191   : > { %765 = vperm.xlu1 %1835, %v2172_v3  }
 0x192   : > { %1838 = vset.pattern.permute.xlu2 %v2046_v39 }
 0x193   : > { %795 = vperm.xlu2 %1838, %v2172_v3  }
 0x199   : > { %1837 = vset.pattern.permute.xlu1 %v2047_v49 }
 0x19a   : > { %785 = vperm.xlu1 %1837, %v2172_v3  }
 0x19d   : > { %v666_v1 = vpop.permute.xlu0 %665 }
 0x1a2   : > { %1840 = vset.pattern.permute.xlu1 %v2044_v47 }
 0x1a3   : > { %813 = vperm.xlu1 %1840, %v2172_v3  }
 0x1a5   : > { %v2449_v55 = vpop.permute.xlu1 %705 }
 0x1a6   : > { %v2467_v20 = vpop.permute.xlu0 %695 }
 0x1bb   : > { %v553_v59 = vpop.permute.xlu2 %552 }
 0x1c3   : > { %v2459_v5 = vpop.permute.xlu2 %725 }
 0x1cb   : > { %v565_v22 = vpop.permute.xlu2 %564 }
 0x1d2   : > { %v551_v31 = vpop.permute.xlu1 %550  ;;  %v557_v58 = vpop.permute.xlu0 %556 }
 0x1d3   : > { %v554_v18 = vsel %vm274_vm1, %v551_v31, %v553_v59  ;;  %v555_v3 = vsel %vm274_vm1, %v553_v59, %v551_v31  ;;  %v2482_v59 = vadd.s32 248, %v2472_v35  ;;  %v2484_v31 = vpop.permute.xlu2 %570 }
 0x1d4   : > { %v578_v60 = vmul.f32 %v576_v51, %v555_v3  ;;  %v579_v61 = vmul.f32 %v576_v51, %v554_v18 }
 0x1d6   : > { %v584_v12 = vadd.f32 %v582_v17, %v578_v60  ;;  %v585_v0 = vadd.f32 %v582_v17, %v579_v61  ;;  %v2048_v17 = vmov 2.0  }
 0x1d7   : > { %1844 = vrcp.f32 %v2048_v17 }
 0x1d8   : > { %v586_v9 = vadd.f32 %v584_v12, %v2409_v40  ;;  %v587_v19 = vadd.f32 %v585_v0, %v2411_v42  ;;  %v935_v0 = vcvt.s32.f32 %v2482_v59 }
 0x1da   : > { %v588_v2 = vmax.f32 %v586_v9, 0.0  ;;  %v2457_v4 = vpop.permute.xlu1 %635  ;;  %v589_v7 = vmax.f32 %v587_v19, 0.0 }
 0x1db   : > { %v746_v17 = vpop.permute.xlu2 %745 }
 0x1dc   : > { %v590_v46 = vsel %vm200_vm2, %v2409_v40, %v588_v2  ;;  %v591_v16 = vsel %vm201_vm3, %v2411_v42, %v589_v7 }
 0x1dd   : > { %v650_v6 = vperm.slane %v590_v46, 0  ;;  %v658_v62 = vperm.slane %v590_v46, 1  ;;  %v651_v13 = vperm.slane %v591_v16, 0  ;;  %v659_v63 = vperm.slane %v591_v16, 1  ;;  %v2496_v7 = vpop.eup %1844 }
 0x1de   : > { %v668_v30 = vperm.slane %v590_v46, 2  ;;  %v669_v32 = vperm.slane %v591_v16, 2  ;;  %v678_v45 = vperm.slane %v590_v46, 3  ;;  %v679_v36 = vperm.slane %v591_v16, 3 }
 0x1df   : > { %v652_v28 = vmul.f32 %v650_v6, %v648_v11  ;;  %v660_v24 = vmul.f32 %v658_v62, %v656_v8  ;;  %v653_v27 = vmul.f32 %v651_v13, %v648_v11  ;;  %v661_v10 = vmul.f32 %v659_v63, %v656_v8 }
 0x1e0   : > { %v670_v43 = vmul.f32 %v668_v30, %v666_v1  ;;  %v671_v39 = vmul.f32 %v669_v32, %v666_v1  ;;  %v2479_v11 = vadd.s32 120, %v2472_v35  ;;  %v680_v60 = vmul.f32 %v678_v45, %v676_v14 }
 0x1e1   : > { %v662_v33 = vadd.f32 %v660_v24, %v652_v28  ;;  %v663_v41 = vadd.f32 %v661_v10, %v653_v27  ;;  %v681_v61 = vmul.f32 %v679_v36, %v676_v14  ;;  %v2492_v1 = vadd.s32 240, %v2472_v35 }
 0x1e2   : > { %v919_v12 = vcvt.s32.f32 %v2479_v11  ;;  %v967_v46 = vadd.f32 0.5, %v935_v0  ;;  %v2504_v63 = vmul.f32 2.0, %v2496_v7  ;;  %v2515_v30 = vadd.s32 104, %v2472_v35 }
 0x1e3   : > { %v2469_v21 = vpop.permute.xlu1 %735  ;;  %v672_v8 = vadd.f32 %v670_v43, %v662_v33  ;;  %v673_v26 = vadd.f32 %v671_v39, %v663_v41  ;;  %v934_v28 = vcvt.s32.f32 %v2492_v1  ;;  %vm1133_vm13 = vweird.f32 %v2496_v7 }
 0x1e4   : > { %v951_v14 = vadd.f32 0.5, %v919_v12 }
 0x1e5   : > { %v682_v2 = vadd.f32 %v680_v60, %v672_v8 }
 0x1e6   : > { %v2512_v10 = vmul.f32 %v951_v14, %v2279_v44 }
 0x1eb   : > { %v559_v25 = vpop.permute.xlu1 %558 }
 0x1ec   : > { %v560_v47 = vsel %vm281_vm4, %v557_v58, %v559_v25  ;;  %v561_v48 = vsel %vm281_vm4, %v559_v25, %v557_v58 }
 0x1ed   : > { %v596_v49 = vmul.f32 %v594_v50, %v560_v47  ;;  %v597_v51 = vmul.f32 %v594_v50, %v561_v48  ;;  %v2489_v50 = vadd.s32 112, %v2472_v35 }
 0x1ef   : > { %v602_v18 = vadd.f32 %v600_v56, %v596_v49  ;;  %v603_v3 = vadd.f32 %v600_v56, %v597_v51  ;;  %v683_v56 = vadd.f32 %v681_v61, %v673_v26  ;;  %v918_v16 = vcvt.s32.f32 %v2489_v50 }
 0x1f0   : > { %v2531_v26 = vmul.f32 %v967_v46, %v2279_v44  ;;  %v1015_v46 = vfloor.f32 %v2512_v10 }
 0x1f1   : > { %v604_v9 = vadd.f32 %v602_v18, %v2409_v40  ;;  %v605_v19 = vadd.f32 %v603_v3, %v2411_v42 }
 0x1f3   : > { %v606_v6 = vmax.f32 %v604_v9, 0.0  ;;  %v607_v62 = vmax.f32 %v605_v19, 0.0  ;;  %v563_v13 = vpop.permute.xlu1 %562 }
 0x1f4   : > { %v566_v24 = vsel %vm288_vm7, %v563_v13, %v565_v22  ;;  %v567_v27 = vsel %vm288_vm7, %v565_v22, %v563_v13 }
 0x1f5   : > { %v614_v32 = vmul.f32 %v2441_v15, %v566_v24  ;;  %v615_v33 = vmul.f32 %v2441_v15, %v567_v27  ;;  %v608_v41 = vsel %vm206_vm5, %v2409_v40, %v606_v6  ;;  %v609_v58 = vsel %vm207_vm6, %v2411_v42, %v607_v62  ;;  %v716_v15 = vpop.permute.xlu0 %715 }
 0x1f6   : > { %v688_v25 = vperm.slane %v608_v41, 0  ;;  %v689_v22 = vperm.slane %v609_v58, 0  ;;  %v698_v43 = vperm.slane %v608_v41, 1  ;;  %v699_v45 = vperm.slane %v609_v58, 1 }
 0x1f7   : > { %v620_v36 = vadd.f32 %v2445_v53, %v614_v32  ;;  %v621_v47 = vadd.f32 %v2445_v53, %v615_v33  ;;  %v708_v48 = vperm.slane %v608_v41, 2  ;;  %v709_v39 = vperm.slane %v609_v58, 2 }
 0x1f8   : > { %v690_v49 = vmul.f32 %v688_v25, %v2443_v52  ;;  %v691_v51 = vmul.f32 %v689_v22, %v2443_v52  ;;  %v700_v8 = vmul.f32 %v698_v43, %v2467_v20  ;;  %v701_v60 = vmul.f32 %v699_v45, %v2467_v20 }
 0x1f9   : > { %v622_v18 = vadd.f32 %v620_v36, %v2409_v40  ;;  %v623_v3 = vadd.f32 %v621_v47, %v2411_v42  ;;  %v710_v53 = vmul.f32 %v708_v48, %v2449_v55  ;;  %v718_v19 = vperm.slane %v608_v41, 3 }
 0x1fa   : > { %v692_v61 = vadd.f32 %v690_v49, %v682_v2  ;;  %v693_v9 = vadd.f32 %v691_v51, %v683_v56  ;;  %v719_v14 = vperm.slane %v609_v58, 3  ;;  %v711_v52 = vmul.f32 %v709_v39, %v2449_v55  ;;  %v776_v49 = vpop.permute.xlu2 %775 }
 0x1fb   : > { %v624_v6 = vmax.f32 %v622_v18, 0.0  ;;  %v625_v62 = vmax.f32 %v623_v3, 0.0  ;;  %v569_v13 = vpop.permute.xlu1 %568  ;;  %v720_v32 = vmul.f32 %v718_v19, %v716_v15  ;;  %v1047_v19 = vmul.f32 16.0, %v1015_v46 }
 0x1fc   : > { %v702_v24 = vadd.f32 %v700_v8, %v692_v61  ;;  %v703_v27 = vadd.f32 %v701_v60, %v693_v9  ;;  %v721_v33 = vmul.f32 %v719_v14, %v716_v15  ;;  %v572_v56 = vsel %vm295_vm10, %v569_v13, %v2484_v31 }
 0x1fd   : > { %v626_v20 = vsel %vm202_vm8, %v2409_v40, %v624_v6  ;;  %v627_v2 = vsel %vm203_vm9, %v2411_v42, %v625_v62  ;;  %v573_v55 = vsel %vm295_vm10, %v2484_v31, %v569_v13  ;;  %v633_v3 = vmul.f32 %v2447_v37, %v572_v56  ;;  %v756_v60 = vpop.permute.xlu0 %755 }
 0x1fe   : > { %v712_v10 = vadd.f32 %v710_v53, %v702_v24  ;;  %v713_v41 = vadd.f32 %v711_v52, %v703_v27  ;;  %v728_v58 = vperm.slane %v626_v20, 0  ;;  %v729_v25 = vperm.slane %v627_v2, 0 }
 0x1ff   : > { %v738_v22 = vperm.slane %v626_v20, 1  ;;  %v739_v43 = vperm.slane %v627_v2, 1  ;;  %v748_v54 = vperm.slane %v626_v20, 2  ;;  %v749_v45 = vperm.slane %v627_v2, 2 }
 0x200   : > { %v722_v36 = vadd.f32 %v720_v32, %v712_v10  ;;  %v723_v47 = vadd.f32 %v721_v33, %v713_v41  ;;  %v730_v57 = vmul.f32 %v728_v58, %v2459_v5  ;;  %v731_v48 = vmul.f32 %v729_v25, %v2459_v5 }
 0x201   : > { %v740_v39 = vmul.f32 %v738_v22, %v2469_v21  ;;  %v741_v15 = vmul.f32 %v739_v43, %v2469_v21  ;;  %v750_v29 = vmul.f32 %v748_v54, %v746_v17  ;;  %v751_v31 = vmul.f32 %v749_v45, %v746_v17 }
 0x202   : > { %v732_v51 = vadd.f32 %v730_v57, %v722_v36  ;;  %v733_v8 = vadd.f32 %v731_v48, %v723_v47  ;;  %v632_v18 = vmul.f32 %v2447_v37, %v573_v55  ;;  %v758_v53 = vperm.slane %v626_v20, 3  ;;  %v796_v36 = vpop.permute.xlu2 %795 }
 0x203   : > { %v759_v61 = vperm.slane %v627_v2, 3  ;;  %v766_v9 = vpop.permute.xlu1 %765  ;;  %v1111_v14 = vadd.f32 0.5, %v1015_v46  ;;  %v639_v21 = vadd.f32 %v2457_v4, %v633_v3  ;;  %v1079_v13 = vsub.f32 %v919_v12, %v1047_v19 }
 0x204   : > { %v742_v5 = vadd.f32 %v740_v39, %v732_v51  ;;  %v743_v6 = vadd.f32 %v741_v15, %v733_v8  ;;  %v638_v62 = vadd.f32 %v2457_v4, %v632_v18  ;;  %v760_v17 = vmul.f32 %v758_v53, %v756_v60 }
 0x205   : > { %v761_v52 = vmul.f32 %v759_v61, %v756_v60  ;;  %v1130_v24 = vsub.f32 1.0, %v2504_v63  ;;  %v641_v33 = vadd.f32 %v639_v21, %v2411_v42  ;;  %v1246_v20 = vadd.f32 0.5, %v1079_v13 }
 0x206   : > { %v752_v37 = vadd.f32 %v750_v29, %v742_v5  ;;  %v753_v27 = vadd.f32 %v751_v31, %v743_v6  ;;  %v640_v32 = vadd.f32 %v638_v62, %v2409_v40  ;;  %v1031_v4 = vfloor.f32 %v2531_v26 }
 0x207   : > { %v1131_v46 = vmul.f32 %v2496_v7, %v1130_v24  ;;  %v643_v56 = vmax.f32 %v641_v33, 0.0  ;;  %v950_v25 = vadd.f32 0.5, %v918_v16  ;;  %v966_v26 = vadd.f32 0.5, %v934_v28 }
 0x208   : > { %v642_v2 = vmax.f32 %v640_v32, 0.0  ;;  %v762_v55 = vadd.f32 %v760_v17, %v752_v37  ;;  %v763_v11 = vadd.f32 %v761_v52, %v753_v27  ;;  %v1063_v63 = vmul.f32 16.0, %v1031_v4  ;;  %v806_v37 = vpop.permute.xlu0 %805 }
 0x209   : > { %v1132_v12 = vadd.f32 %v2496_v7, %v1131_v46  ;;  %v1127_v10 = vadd.f32 0.5, %v1031_v4  ;;  %v645_v58 = vsel %vm205_vm12, %v2411_v42, %v643_v56  ;;  %v982_v19 = vmul.f32 %v950_v25, %v2279_v44 }
 0x20a   : > { %v644_v41 = vsel %vm204_vm11, %v2409_v40, %v642_v2  ;;  %v779_v43 = vperm.slane %v645_v58, 1  ;;  %v769_v45 = vperm.slane %v645_v58, 0  ;;  %v799_v57 = vperm.slane %v645_v58, 3 }
 0x20b   : > { %v778_v22 = vperm.slane %v644_v41, 1  ;;  %v768_v54 = vperm.slane %v644_v41, 0  ;;  %v798_v47 = vperm.slane %v644_v41, 3  ;;  %v788_v23 = vperm.slane %v644_v41, 2 }
 0x20c   : > { %v786_v48 = vpop.permute.xlu1 %785  ;;  %v789_v40 = vperm.slane %v645_v58, 2  ;;  %v781_v15 = vmul.f32 %v779_v43, %v776_v49  ;;  %v771_v42 = vmul.f32 %v769_v45, %v766_v9  ;;  %v801_v31 = vmul.f32 %v799_v57, %v796_v36 }
 0x20d   : > { %v780_v39 = vmul.f32 %v778_v22, %v776_v49  ;;  %v770_v34 = vmul.f32 %v768_v54, %v766_v9  ;;  %v800_v29 = vmul.f32 %v798_v47, %v796_v36  ;;  %v790_v51 = vmul.f32 %v788_v23, %v786_v48 }
 0x20e   : > { %v791_v8 = vmul.f32 %v789_v40, %v786_v48  ;;  %v773_v3 = vadd.f32 %v771_v42, %v763_v11  ;;  %v2581_v60 = vsel %vm1133_vm13, %v2496_v7, %v1132_v12  ;;  %v1095_v53 = vsub.f32 %v935_v0, %v1063_v63 }
 0x20f   : > { %v772_v18 = vadd.f32 %v770_v34, %v762_v55  ;;  %v1150_v61 = vmul.f32 %v2581_v60, %v1111_v14  ;;  %v1278_v49 = vmul.f32 %v1246_v20, %v2581_v60  ;;  %v1166_v9 = vmul.f32 %v2581_v60, %v1127_v10 }
 0x210   : > { %v783_v6 = vadd.f32 %v781_v15, %v773_v3  ;;  %v1262_v62 = vadd.f32 0.5, %v1095_v53  ;;  %v998_v21 = vmul.f32 %v966_v26, %v2279_v44  ;;  %v1014_v13 = vfloor.f32 %v982_v19 }
 0x211   : > { %v782_v5 = vadd.f32 %v780_v39, %v772_v18  ;;  %v1182_v17 = vfloor.f32 %v1150_v61  ;;  %v1310_v7 = vfloor.f32 %v1278_v49  ;;  %v1198_v52 = vfloor.f32 %v1166_v9 }
 0x212   : > { %v793_v0 = vadd.f32 %v791_v8, %v783_v6  ;;  %v1294_v14 = vmul.f32 %v1262_v62, %v2581_v60  ;;  %v1030_v24 = vfloor.f32 %v998_v21  ;;  %v1046_v33 = vmul.f32 16.0, %v1014_v13 }
 0x213   : > { %v792_v59 = vadd.f32 %v790_v51, %v782_v5  ;;  %v1214_v27 = vmul.f32 8.0, %v1182_v17  ;;  %v1230_v32 = vmul.f32 8.0, %v1198_v52  ;;  %v1110_v46 = vadd.f32 0.5, %v1014_v13 }
 0x214   : > { %v803_v4 = vadd.f32 %v801_v31, %v793_v0  ;;  %v1326_v2 = vfloor.f32 %v1294_v14  ;;  %v1062_v56 = vmul.f32 16.0, %v1030_v24  ;;  %v1078_v11 = vsub.f32 %v918_v16, %v1046_v33 }
 0x215   : > { %v802_v20 = vadd.f32 %v800_v29, %v792_v59  ;;  %v1342_v55 = vadd.f32 %v1310_v7, %v1214_v27  ;;  %v1149_v12 = vmul.f32 %v2581_v60, %v1110_v46  ;;  %v1126_v63 = vadd.f32 0.5, %v1030_v24  ;;  %v814_v26 = vpop.permute.xlu1 %813 }
 0x216   : > { %v809_v41 = vadd.f32 %v806_v37, %v803_v4  ;;  %v1358_v58 = vadd.f32 %v1326_v2, %v1230_v32  ;;  %v1094_v25 = vsub.f32 %v934_v28, %v1062_v56  ;;  %v1245_v54 = vadd.f32 0.5, %v1078_v11 }
 0x217   : > { %v808_v10 = vadd.f32 %v806_v37, %v802_v20  ;;  %v1374_v22 = vsub.f32 %v1342_v55, %v2273_v38  ;;  %v1181_v43 = vfloor.f32 %v1149_v12  ;;  %v1165_v45 = vmul.f32 %v2581_v60, %v1126_v63 }
 0x218   : > { %v811_v47 = vmax.f32 %v809_v41, 0.0  ;;  %v1390_v50 = vsub.f32 %v1358_v58, %v2273_v38  ;;  %v1261_v16 = vadd.f32 0.5, %v1094_v25  ;;  %v1277_v23 = vmul.f32 %v1245_v54, %v2581_v60 }
 0x219   : > { %v810_v36 = vmax.f32 %v808_v10, 0.0  ;;  %v1406_v57 = vand.u32 2147483647, %v1374_v22  ;;  %v1213_v48 = vmul.f32 8.0, %v1181_v43  ;;  %v1197_v40 = vfloor.f32 %v1165_v45 }
 0x21a   : > { %v817_v1 = vmul.f32 %v814_v26, %v811_v47  ;;  %v1422_v28 = vand.u32 2147483647, %v1390_v50  ;;  %v1293_v15 = vmul.f32 %v1261_v16, %v2581_v60  ;;  %v1309_v34 = vfloor.f32 %v1277_v23 }
 0x21b   : > { %v816_v39 = vmul.f32 %v814_v26, %v810_v36  ;;  %vm1438_vm15 = vcmp.lt.f32.partialorder %v1406_v57, 0.5  ;;  %v1229_v42 = vmul.f32 8.0, %v1197_v40  ;;  %v917_v29 = vcvt.s32.f32 %v2515_v30 }
 0x21c   : > { %v826_v51 = vsel %vm818_vm14, %v817_v1, 0.0  ;;  %v2049_v8 = vmov 0.25   ;;  %vm1454_vm0 = vcmp.lt.f32.partialorder %v1422_v28, 0.5  ;;  %v1325_v18 = vfloor.f32 %v1293_v15 }
 0x21d   : > { %v819_v31 = vsel %vm818_vm14, %v816_v39, 0.0  ;;  %1630 = vmatpush.msk.msra.mxu0 %vm1438_vm15, %v2049_v8  ;;  %v827_v53 = vrot.slane %v826_v51, 4  ;;  %1646 = vmatpush.msk.msra.mxu1 %vm1454_vm0, %v2049_v8  ;;  %v1341_v61 = vadd.f32 %v1309_v34, %v1213_v48  ;;  %v949_v49 = vadd.f32 0.5, %v917_v29 }
 0x21e   : > { %v820_v3 = vrot.slane %v819_v31, 4  ;;  %v1357_v9 = vadd.f32 %v1325_v18, %v1229_v42  ;;  %v901_v19 = vadd.s32 232, %v2472_v35  ;;  %v884_v30 = vadd.s32 96, %v2472_v35 }
 0x21f   : > { %v900_v5 = vadd.s32 224, %v2472_v35  ;;  %v828_v62 = vadd.f32 %v827_v53, %v826_v51  ;;  %v1373_v21 = vsub.f32 %v1341_v61, %v2273_v38  ;;  %v981_v17 = vmul.f32 %v949_v49, %v2279_v44 }
 0x220   : > { %v821_v6 = vadd.f32 %v820_v3, %v819_v31  ;;  %v1389_v7 = vsub.f32 %v1357_v9, %v2273_v38  ;;  %v933_v52 = vcvt.s32.f32 %v901_v19  ;;  %v916_v13 = vcvt.s32.f32 %v884_v30 }
 0x221   : > { %v932_v59 = vcvt.s32.f32 %v900_v5  ;;  %v829_v14 = vrot.slane %v828_v62, 2  ;;  %v1405_v24 = vand.u32 2147483647, %v1373_v21  ;;  %v1013_v37 = vfloor.f32 %v981_v17 }
 0x222   : > { %v822_v0 = vrot.slane %v821_v6, 2  ;;  %v1421_v27 = vand.u32 2147483647, %v1389_v7  ;;  %v965_v32 = vadd.f32 0.5, %v933_v52  ;;  %v948_v33 = vadd.f32 0.5, %v916_v13 }
 0x223   : > { %v964_v46 = vadd.f32 0.5, %v932_v59  ;;  %v830_v4 = vadd.f32 %v829_v14, %v828_v62  ;;  %vm1437_vm1 = vcmp.lt.f32.partialorder %v1405_v24, 0.5  ;;  %v1045_v2 = vmul.f32 16.0, %v1013_v37 }
 0x224   : > { %v823_v20 = vadd.f32 %v822_v0, %v821_v6  ;;  %1631 = vmatpush.msk.msra.mxu0 %vm1437_vm1, %v2049_v8  ;;  %vm1453_vm2 = vcmp.lt.f32.partialorder %v1421_v27, 0.5  ;;  %v1109_v56 = vadd.f32 0.5, %v1013_v37  ;;  %v997_v55 = vmul.f32 %v965_v32, %v2279_v44 }
 0x225   : > { %v980_v11 = vmul.f32 %v948_v33, %v2279_v44  ;;  %v831_v63 = vrot.slane %v830_v4, 1  ;;  %1647 = vmatpush.msk.msra.mxu1 %vm1453_vm2, %v2049_v8  ;;  %v1077_v10 = vsub.f32 %v917_v29, %v1045_v2  ;;  %v996_v41 = vmul.f32 %v964_v46, %v2279_v44 }
 0x226   : > { %v824_v12 = vrot.slane %v823_v20, 1  ;;  %v1148_v58 = vmul.f32 %v2581_v60, %v1109_v56  ;;  %v1029_v25 = vfloor.f32 %v997_v55  ;;  %v2619_v22 = vadd.s32 88, %v2472_v35 }
 0x227   : > { %v1012_v26 = vfloor.f32 %v980_v11  ;;  %v832_v54 = vadd.f32 %v831_v63, %v830_v4  ;;  %v1244_v45 = vadd.f32 0.5, %v1077_v10  ;;  %v1028_v36 = vfloor.f32 %v996_v41 }
 0x228   : > { %v825_v43 = vadd.f32 %v824_v12, %v823_v20  ;;  %v1180_v47 = vfloor.f32 %v1148_v58  ;;  %v1061_v50 = vmul.f32 16.0, %v1029_v25  ;;  %v1125_v16 = vadd.f32 0.5, %v1029_v25 }
 0x229   : > { %v1044_v57 = vmul.f32 16.0, %v1012_v26  ;;  %v1629_v23 = vmul.f32 -1.442695, %v832_v54  ;;  %v1276_v40 = vmul.f32 %v1244_v45, %v2581_v60  ;;  %v1108_v39 = vadd.f32 0.5, %v1012_v26 }
 0x22a   : > { %v1628_v48 = vmul.f32 -1.442695, %v825_v43  ;;  %v1212_v1 = vmul.f32 8.0, %v1180_v47  ;;  %v1093_v28 = vsub.f32 %v933_v52, %v1061_v50  ;;  %v1164_v15 = vmul.f32 %v2581_v60, %v1125_v16 }
 0x22b   : > { %v1076_v34 = vsub.f32 %v916_v13, %v1044_v57  ;;  %v1308_v42 = vfloor.f32 %v1276_v40  ;;  %v1147_v29 = vmul.f32 %v2581_v60, %v1108_v39  ;;  %v1060_v31 = vmul.f32 16.0, %v1028_v36 }
 0x22c   : > { %1846 = vpow2.f32 %v1628_v48  ;;  %v1196_v51 = vfloor.f32 %v1164_v15  ;;  %v1260_v18 = vadd.f32 0.5, %v1093_v28  ;;  %v1124_v9 = vadd.f32 0.5, %v1028_v36 }
 0x22d   : > { %1848 = vpow2.f32 %v1629_v23  ;;  %v1243_v3 = vadd.f32 0.5, %v1076_v34  ;;  %v1340_v53 = vadd.f32 %v1308_v42, %v1212_v1  ;;  %v1179_v61 = vfloor.f32 %v1147_v29 }
 0x22e   : > { %v1092_v49 = vsub.f32 %v932_v59, %v1060_v31  ;;  %v1228_v19 = vmul.f32 8.0, %v1196_v51  ;;  %v1292_v30 = vmul.f32 %v1260_v18, %v2581_v60  ;;  %v915_v6 = vcvt.s32.f32 %v2619_v22 }
 0x22f   : > { %v1275_v5 = vmul.f32 %v1243_v3, %v2581_v60  ;;  %v1372_v62 = vsub.f32 %v1340_v53, %v2273_v38  ;;  %v1211_v21 = vmul.f32 8.0, %v1179_v61  ;;  %v1163_v17 = vmul.f32 %v2581_v60, %v1124_v9 }
 0x230   : > { %v1259_v7 = vadd.f32 0.5, %v1092_v49  ;;  %v1324_v52 = vfloor.f32 %v1292_v30  ;;  %v947_v0 = vadd.f32 0.5, %v915_v6  ;;  %v2630_v14 = vadd.s32 216, %v2472_v35 }
 0x231   : > { %v1307_v13 = vfloor.f32 %v1275_v5  ;;  %v1404_v24 = vand.u32 2147483647, %v1372_v62  ;;  %v1195_v37 = vfloor.f32 %v1163_v17  ;;  %v882_v32 = vadd.s32 80, %v2472_v35 }
 0x232   : > { %v1847_v59 = vpop.eup %1846  ;;  %v1291_v27 = vmul.f32 %v1259_v7, %v2581_v60  ;;  %v1356_v20 = vadd.f32 %v1324_v52, %v1228_v19  ;;  %v979_v2 = vmul.f32 %v947_v0, %v2279_v44  ;;  %v931_v58 = vcvt.s32.f32 %v2630_v14 }
 0x233   : > { %v1849_v33 = vpop.eup %1848  ;;  %v2634_v46 = vadd.f32 1.0, %v1847_v59  ;;  %v1339_v4 = vadd.f32 %v1307_v13, %v1211_v21  ;;  %vm1436_vm3 = vcmp.lt.f32.partialorder %v1404_v24, 0.5  ;;  %v1227_v56 = vmul.f32 8.0, %v1195_v37 }
 0x234   : > { %v1323_v55 = vfloor.f32 %v1291_v27  ;;  %v2637_v11 = vadd.f32 1.0, %v1849_v33  ;;  %1632 = vmatpush.msk.msra.mxu0 %vm1436_vm3, %v2049_v8  ;;  %v1388_v12 = vsub.f32 %v1356_v20, %v2273_v38  ;;  %v1011_v10 = vfloor.f32 %v979_v2 }
 0x235   : > { %v1371_v63 = vsub.f32 %v1339_v4, %v2273_v38  ;;  %1850 = vrcp.f32 %v2634_v46  ;;  %v914_v25 = vcvt.s32.f32 %v882_v32  ;;  %v963_v36 = vadd.f32 0.5, %v931_v58 }
 0x236   : > { %v1355_v41 = vadd.f32 %v1323_v55, %v1227_v56  ;;  %v1420_v26 = vand.u32 2147483647, %v1388_v12  ;;  %v1043_v43 = vmul.f32 16.0, %v1011_v10  ;;  %v1107_v54 = vadd.f32 0.5, %v1011_v10 }
 0x237   : > { %v1403_v22 = vand.u32 2147483647, %v1371_v63  ;;  %v946_v47 = vadd.f32 0.5, %v914_v25  ;;  %v898_v50 = vadd.s32 208, %v2472_v35  ;;  %v995_v23 = vmul.f32 %v963_v36, %v2279_v44 }
 0x238   : > { %v1387_v45 = vsub.f32 %v1355_v41, %v2273_v38  ;;  %vm1452_vm4 = vcmp.lt.f32.partialorder %v1420_v26, 0.5  ;;  %v1075_v16 = vsub.f32 %v915_v6, %v1043_v43  ;;  %v1146_v57 = vmul.f32 %v2581_v60, %v1107_v54 }
 0x239   : > { %vm1435_vm5 = vcmp.lt.f32.partialorder %v1403_v22, 0.5  ;;  %1648 = vmatpush.msk.msra.mxu1 %vm1452_vm4, %v2049_v8  ;;  %v978_v40 = vmul.f32 %v946_v47, %v2279_v44  ;;  %v930_v39 = vcvt.s32.f32 %v898_v50  ;;  %v881_v15 = vadd.s32 72, %v2472_v35 }
 0x23a   : > { %1633 = vmatpush.msk.msra.mxu0 %vm1435_vm5, %v2049_v8  ;;  %v1419_v48 = vand.u32 2147483647, %v1387_v45  ;;  %v1178_v1 = vfloor.f32 %v1146_v57  ;;  %v1242_v28 = vadd.f32 0.5, %v1075_v16  ;;  %v2653_v34 = vadd.s32 200, %v2472_v35 }
 0x23b   : > { %v2655_v42 = vpop.eup %1850  ;;  %v1027_v29 = vfloor.f32 %v995_v23  ;;  %v1010_v31 = vfloor.f32 %v978_v40  ;;  %v962_v51 = vadd.f32 0.5, %v930_v39  ;;  %v913_v53 = vcvt.s32.f32 %v881_v15 }
 0x23c   : > { %vm1451_vm6 = vcmp.lt.f32.partialorder %v1419_v48, 0.5  ;;  %v1210_v18 = vmul.f32 8.0, %v1178_v1  ;;  %v1274_v3 = vmul.f32 %v1242_v28, %v2581_v60  ;;  %v929_v61 = vcvt.s32.f32 %v2653_v34 }
 0x23d   : > { %1649 = vmatpush.msk.msra.mxu1 %vm1451_vm6, %v2049_v8  ;;  %v1059_v49 = vmul.f32 16.0, %v1027_v29  ;;  %v1123_v9 = vadd.f32 0.5, %v1027_v29  ;;  %v1042_v19 = vmul.f32 16.0, %v1010_v31  ;;  %v1106_v30 = vadd.f32 0.5, %v1010_v31 }
 0x23e   : > { %v1306_v5 = vfloor.f32 %v1274_v3  ;;  %v994_v6 = vmul.f32 %v962_v51, %v2279_v44  ;;  %v945_v62 = vadd.f32 0.5, %v913_v53  ;;  %v961_v21 = vadd.f32 0.5, %v929_v61 }
 0x23f   : > { %v1091_v17 = vsub.f32 %v931_v58, %v1059_v49  ;;  %v1162_v7 = vmul.f32 %v2581_v60, %v1123_v9  ;;  %v1074_v52 = vsub.f32 %v914_v25, %v1042_v19  ;;  %v1145_v13 = vmul.f32 %v2581_v60, %v1106_v30 }
 0x240   : > { %v1338_v0 = vadd.f32 %v1306_v5, %v1210_v18  ;;  %v1026_v14 = vfloor.f32 %v994_v6  ;;  %v977_v59 = vmul.f32 %v945_v62, %v2279_v44  ;;  %v993_v24 = vmul.f32 %v961_v21, %v2279_v44 }
 0x241   : > { %v1194_v37 = vfloor.f32 %v1162_v7  ;;  %v1258_v27 = vadd.f32 0.5, %v1091_v17  ;;  %v1177_v32 = vfloor.f32 %v1145_v13  ;;  %v1241_v33 = vadd.f32 0.5, %v1074_v52 }
 0x242   : > { %v1370_v20 = vsub.f32 %v1338_v0, %v2273_v38  ;;  %v1058_v4 = vmul.f32 16.0, %v1026_v14  ;;  %v1122_v2 = vadd.f32 0.5, %v1026_v14  ;;  %v1009_v56 = vfloor.f32 %v977_v59 }
 0x243   : > { %v1226_v55 = vmul.f32 8.0, %v1194_v37  ;;  %v1290_v12 = vmul.f32 %v1258_v27, %v2581_v60  ;;  %v1209_v63 = vmul.f32 8.0, %v1177_v32  ;;  %v1273_v10 = vmul.f32 %v1241_v33, %v2581_v60 }
 0x244   : > { %v1402_v41 = vand.u32 2147483647, %v1370_v20  ;;  %v1090_v58 = vsub.f32 %v930_v39, %v1058_v4  ;;  %v1161_v25 = vmul.f32 %v2581_v60, %v1122_v2  ;;  %v1041_v26 = vmul.f32 16.0, %v1009_v56 }
 0x245   : > { %v1322_v22 = vfloor.f32 %v1290_v12  ;;  %v1305_v43 = vfloor.f32 %v1273_v10  ;;  %v1105_v54 = vadd.f32 0.5, %v1009_v56  ;;  %v1025_v45 = vfloor.f32 %v993_v24 }
 0x246   : > { %vm1434_vm7 = vcmp.lt.f32.partialorder %v1402_v41, 0.5  ;;  %v1193_v36 = vfloor.f32 %v1161_v25  ;;  %v1257_v47 = vadd.f32 0.5, %v1090_v58  ;;  %v1073_v50 = vsub.f32 %v913_v53, %v1041_v26 }
 0x247   : > { %1634 = vmatpush.msk.msra.mxu0 %vm1434_vm7, %v2049_v8  ;;  %v1354_v16 = vadd.f32 %v1322_v22, %v1226_v55  ;;  %v1337_v57 = vadd.f32 %v1305_v43, %v1209_v63  ;;  %v1144_v48 = vmul.f32 %v2581_v60, %v1105_v54  ;;  %v1057_v23 = vmul.f32 16.0, %v1025_v45 }
 0x248   : > { %v1225_v40 = vmul.f32 8.0, %v1193_v36  ;;  %v1289_v39 = vmul.f32 %v1257_v47, %v2581_v60  ;;  %v1240_v1 = vadd.f32 0.5, %v1073_v50  ;;  %v1121_v28 = vadd.f32 0.5, %v1025_v45 }
 0x249   : > { %v1386_v15 = vsub.f32 %v1354_v16, %v2273_v38  ;;  %v1369_v34 = vsub.f32 %v1337_v57, %v2273_v38  ;;  %v1176_v29 = vfloor.f32 %v1144_v48  ;;  %v1089_v31 = vsub.f32 %v929_v61, %v1057_v23 }
 0x24a   : > { %v1321_v51 = vfloor.f32 %v1289_v39  ;;  %v1272_v18 = vmul.f32 %v1240_v1, %v2581_v60  ;;  %v1160_v3 = vmul.f32 %v2581_v60, %v1121_v28  ;;  %v880_v53 = vadd.s32 64, %v2472_v35 }
 0x24b   : > { %v1418_v49 = vand.u32 2147483647, %v1386_v15  ;;  %v1401_v9 = vand.u32 2147483647, %v1369_v34  ;;  %v1208_v19 = vmul.f32 8.0, %v1176_v29  ;;  %v1256_v30 = vadd.f32 0.5, %v1089_v31 }
 0x24c   : > { %v1353_v5 = vadd.f32 %v1321_v51, %v1225_v40  ;;  %v1304_v6 = vfloor.f32 %v1272_v18  ;;  %v1192_v62 = vfloor.f32 %v1160_v3  ;;  %v912_v21 = vcvt.s32.f32 %v880_v53 }
 0x24d   : > { %vm1450_vm8 = vcmp.lt.f32.partialorder %v1418_v49, 0.5  ;;  %vm1433_vm9 = vcmp.lt.f32.partialorder %v1401_v9, 0.5  ;;  %v1288_v17 = vmul.f32 %v1256_v30, %v2581_v60  ;;  %v896_v61 = vadd.s32 192, %v2472_v35 }
 0x24e   : > { %1650 = vmatpush.msk.msra.mxu1 %vm1450_vm8, %v2049_v8  ;;  %1635 = vmatpush.msk.msra.mxu0 %vm1433_vm9, %v2049_v8  ;;  %v1385_v7 = vsub.f32 %v1353_v5, %v2273_v38  ;;  %v1336_v52 = vadd.f32 %v1304_v6, %v1208_v19  ;;  %v1224_v13 = vmul.f32 8.0, %v1192_v62  ;;  %v944_v0 = vadd.f32 0.5, %v912_v21 }
 0x24f   : > { %v1320_v14 = vfloor.f32 %v1288_v17  ;;  %v928_v59 = vcvt.s32.f32 %v896_v61  ;;  %v879_v24 = vadd.s32 56, %v2472_v35  ;;  %v895_v37 = vadd.s32 184, %v2472_v35 }
 0x250   : > { %v1417_v27 = vand.u32 2147483647, %v1385_v7  ;;  %v1368_v32 = vsub.f32 %v1336_v52, %v2273_v38  ;;  %v976_v33 = vmul.f32 %v944_v0, %v2279_v44  ;;  %v878_v20 = vadd.s32 48, %v2472_v35 }
 0x251   : > { %v1352_v4 = vadd.f32 %v1320_v14, %v1224_v13  ;;  %v960_v2 = vadd.f32 0.5, %v928_v59  ;;  %v911_v56 = vcvt.s32.f32 %v879_v24  ;;  %v927_v55 = vcvt.s32.f32 %v895_v37 }
 0x252   : > { %vm1449_vm10 = vcmp.lt.f32.partialorder %v1417_v27, 0.5  ;;  %v1400_v12 = vand.u32 2147483647, %v1368_v32  ;;  %v1008_v63 = vfloor.f32 %v976_v33  ;;  %v910_v10 = vcvt.s32.f32 %v878_v20 }
 0x253   : > { %1651 = vmatpush.msk.msra.mxu1 %vm1449_vm10, %v2049_v8  ;;  %v1384_v41 = vsub.f32 %v1352_v4, %v2273_v38  ;;  %v992_v58 = vmul.f32 %v960_v2, %v2279_v44  ;;  %v943_v25 = vadd.f32 0.5, %v911_v56  ;;  %v959_v26 = vadd.f32 0.5, %v927_v55 }
 0x254   : > { %vm1432_vm11 = vcmp.lt.f32.partialorder %v1400_v12, 0.5  ;;  %v1040_v22 = vmul.f32 16.0, %v1008_v63  ;;  %v1104_v43 = vadd.f32 0.5, %v1008_v63  ;;  %v942_v54 = vadd.f32 0.5, %v910_v10 }
 0x255   : > { %1636 = vmatpush.msk.msra.mxu0 %vm1432_vm11, %v2049_v8  ;;  %v1416_v45 = vand.u32 2147483647, %v1384_v41  ;;  %v1024_v36 = vfloor.f32 %v992_v58  ;;  %v975_v47 = vmul.f32 %v943_v25, %v2279_v44  ;;  %v991_v50 = vmul.f32 %v959_v26, %v2279_v44 }
 0x256   : > { %v1072_v16 = vsub.f32 %v912_v21, %v1040_v22  ;;  %v1143_v57 = vmul.f32 %v2581_v60, %v1104_v43  ;;  %v974_v48 = vmul.f32 %v942_v54, %v2279_v44  ;;  %v2696_v23 = vadd.s32 176, %v2472_v35 }
 0x257   : > { %vm1448_vm12 = vcmp.lt.f32.partialorder %v1416_v45, 0.5  ;;  %v1056_v40 = vmul.f32 16.0, %v1024_v36  ;;  %v1120_v39 = vadd.f32 0.5, %v1024_v36  ;;  %v1007_v1 = vfloor.f32 %v975_v47 }
 0x258   : > { %1652 = vmatpush.msk.msra.mxu1 %vm1448_vm12, %v2049_v8  ;;  %v1175_v28 = vfloor.f32 %v1143_v57  ;;  %v1239_v15 = vadd.f32 0.5, %v1072_v16  ;;  %v1023_v34 = vfloor.f32 %v991_v50  ;;  %v1006_v29 = vfloor.f32 %v974_v48 }
 0x259   : > { %v1088_v31 = vsub.f32 %v928_v59, %v1056_v40  ;;  %v1159_v51 = vmul.f32 %v2581_v60, %v1120_v39  ;;  %v1039_v18 = vmul.f32 16.0, %v1007_v1  ;;  %v1103_v3 = vadd.f32 0.5, %v1007_v1 }
 0x25a   : > { %v1207_v53 = vmul.f32 8.0, %v1175_v28  ;;  %v1271_v49 = vmul.f32 %v1239_v15, %v2581_v60  ;;  %v1055_v9 = vmul.f32 16.0, %v1023_v34  ;;  %v1119_v19 = vadd.f32 0.5, %v1023_v34 }
 0x25b   : > { %v1191_v30 = vfloor.f32 %v1159_v51  ;;  %v1255_v5 = vadd.f32 0.5, %v1088_v31  ;;  %v1071_v6 = vsub.f32 %v911_v56, %v1039_v18  ;;  %v1142_v62 = vmul.f32 %v2581_v60, %v1103_v3 }
 0x25c   : > { %v1303_v21 = vfloor.f32 %v1271_v49  ;;  %v1087_v17 = vsub.f32 %v927_v55, %v1055_v9  ;;  %v1158_v61 = vmul.f32 %v2581_v60, %v1119_v19  ;;  %v1038_v7 = vmul.f32 16.0, %v1006_v29 }
 0x25d   : > { %v1223_v52 = vmul.f32 8.0, %v1191_v30  ;;  %v1287_v13 = vmul.f32 %v1255_v5, %v2581_v60  ;;  %v1174_v0 = vfloor.f32 %v1142_v62  ;;  %v1238_v14 = vadd.f32 0.5, %v1071_v6 }
 0x25e   : > { %v1335_v59 = vadd.f32 %v1303_v21, %v1207_v53  ;;  %v1190_v24 = vfloor.f32 %v1158_v61  ;;  %v1254_v37 = vadd.f32 0.5, %v1087_v17  ;;  %v1070_v27 = vsub.f32 %v910_v10, %v1038_v7 }
 0x25f   : > { %v1319_v32 = vfloor.f32 %v1287_v13  ;;  %v1206_v33 = vmul.f32 8.0, %v1174_v0  ;;  %v1270_v20 = vmul.f32 %v1238_v14, %v2581_v60  ;;  %v1102_v4 = vadd.f32 0.5, %v1006_v29 }
 0x260   : > { %v1367_v2 = vsub.f32 %v1335_v59, %v2273_v38  ;;  %v1222_v56 = vmul.f32 8.0, %v1190_v24  ;;  %v1286_v55 = vmul.f32 %v1254_v37, %v2581_v60  ;;  %v1237_v12 = vadd.f32 0.5, %v1070_v27 }
 0x261   : > { %v1351_v63 = vadd.f32 %v1319_v32, %v1223_v52  ;;  %v1302_v41 = vfloor.f32 %v1270_v20  ;;  %v1141_v58 = vmul.f32 %v2581_v60, %v1102_v4  ;;  %v926_v25 = vcvt.s32.f32 %v2696_v23 }
 0x262   : > { %v1399_v26 = vand.u32 2147483647, %v1367_v2  ;;  %v1318_v22 = vfloor.f32 %v1286_v55  ;;  %v1269_v10 = vmul.f32 %v1237_v12, %v2581_v60  ;;  %v877_v43 = vadd.s32 40, %v2472_v35 }
 0x263   : > { %v1383_v54 = vsub.f32 %v1351_v63, %v2273_v38  ;;  %v1334_v45 = vadd.f32 %v1302_v41, %v1206_v33  ;;  %v1173_v36 = vfloor.f32 %v1141_v58  ;;  %v958_v47 = vadd.f32 0.5, %v926_v25 }
 0x264   : > { %vm1431_vm13 = vcmp.lt.f32.partialorder %v1399_v26, 0.5  ;;  %v1350_v50 = vadd.f32 %v1318_v22, %v1222_v56  ;;  %v1301_v16 = vfloor.f32 %v1269_v10  ;;  %v909_v57 = vcvt.s32.f32 %v877_v43 }
 0x265   : > { %1637 = vmatpush.msk.msra.mxu0 %vm1431_vm13, %v2049_v8  ;;  %v1415_v48 = vand.u32 2147483647, %v1383_v54  ;;  %v1366_v23 = vsub.f32 %v1334_v45, %v2273_v38  ;;  %v1205_v40 = vmul.f32 8.0, %v1173_v36  ;;  %v990_v39 = vmul.f32 %v958_v47, %v2279_v44 }
 0x266   : > { %v1382_v1 = vsub.f32 %v1350_v50, %v2273_v38  ;;  %v941_v28 = vadd.f32 0.5, %v909_v57  ;;  %v893_v15 = vadd.s32 168, %v2472_v35  ;;  %v876_v34 = vadd.s32 32, %v2472_v35 }
 0x267   : > { %vm1447_vm14 = vcmp.lt.f32.partialorder %v1415_v48, 0.5  ;;  %v1398_v29 = vand.u32 2147483647, %v1366_v23  ;;  %v1333_v31 = vadd.f32 %v1301_v16, %v1205_v40  ;;  %v1022_v51 = vfloor.f32 %v990_v39 }
 0x268   : > { %1653 = vmatpush.msk.msra.mxu1 %vm1447_vm14, %v2049_v8  ;;  %v1414_v18 = vand.u32 2147483647, %v1382_v1  ;;  %v973_v3 = vmul.f32 %v941_v28, %v2279_v44  ;;  %v925_v53 = vcvt.s32.f32 %v893_v15  ;;  %v908_v49 = vcvt.s32.f32 %v876_v34 }
 0x269   : > { %vm1430_vm15 = vcmp.lt.f32.partialorder %v1398_v29, 0.5  ;;  %v1365_v9 = vsub.f32 %v1333_v31, %v2273_v38  ;;  %v1054_v19 = vmul.f32 16.0, %v1022_v51  ;;  %v1118_v30 = vadd.f32 0.5, %v1022_v51 }
 0x26a   : > { %1638 = vmatpush.msk.msra.mxu0 %vm1430_vm15, %v2049_v8  ;;  %vm1446_vm0 = vcmp.lt.f32.partialorder %v1414_v18, 0.5  ;;  %v1005_v5 = vfloor.f32 %v973_v3  ;;  %v957_v6 = vadd.f32 0.5, %v925_v53  ;;  %v940_v62 = vadd.f32 0.5, %v908_v49 }
 0x26b   : > { %1654 = vmatpush.msk.msra.mxu1 %vm1446_vm0, %v2049_v8  ;;  %v1397_v21 = vand.u32 2147483647, %v1365_v9  ;;  %v1086_v17 = vsub.f32 %v926_v25, %v1054_v19  ;;  %v1157_v61 = vmul.f32 %v2581_v60, %v1118_v30  ;;  %v892_v7 = vadd.s32 160, %v2472_v35 }
 0x26c   : > { %v1037_v52 = vmul.f32 16.0, %v1005_v5  ;;  %v1101_v13 = vadd.f32 0.5, %v1005_v5  ;;  %v989_v0 = vmul.f32 %v957_v6, %v2279_v44  ;;  %v972_v14 = vmul.f32 %v940_v62, %v2279_v44 }
 0x26d   : > { %vm1429_vm1 = vcmp.lt.f32.partialorder %v1397_v21, 0.5  ;;  %v1189_v59 = vfloor.f32 %v1157_v61  ;;  %v1253_v24 = vadd.f32 0.5, %v1086_v17  ;;  %v924_v37 = vcvt.s32.f32 %v892_v7 }
 0x26e   : > { %1639 = vmatpush.msk.msra.mxu0 %vm1429_vm1, %v2049_v8  ;;  %v1069_v27 = vsub.f32 %v909_v57, %v1037_v52  ;;  %v1140_v32 = vmul.f32 %v2581_v60, %v1101_v13  ;;  %v1021_v33 = vfloor.f32 %v989_v0  ;;  %v1004_v20 = vfloor.f32 %v972_v14 }
 0x26f   : > { %v1221_v4 = vmul.f32 8.0, %v1189_v59  ;;  %v1285_v2 = vmul.f32 %v1253_v24, %v2581_v60  ;;  %v956_v56 = vadd.f32 0.5, %v924_v37  ;;  %v2731_v55 = vadd.s32 24, %v2472_v35 }
 0x270   : > { %v1172_v12 = vfloor.f32 %v1140_v32  ;;  %v1236_v63 = vadd.f32 0.5, %v1069_v27  ;;  %v1053_v41 = vmul.f32 16.0, %v1021_v33  ;;  %v1117_v58 = vadd.f32 0.5, %v1021_v33 }
 0x271   : > { %v1317_v25 = vfloor.f32 %v1285_v2  ;;  %v1036_v26 = vmul.f32 16.0, %v1004_v20  ;;  %v1100_v22 = vadd.f32 0.5, %v1004_v20  ;;  %v988_v10 = vmul.f32 %v956_v56, %v2279_v44 }
 0x272   : > { %v1204_v43 = vmul.f32 8.0, %v1172_v12  ;;  %v1268_v54 = vmul.f32 %v1236_v63, %v2581_v60  ;;  %v1085_v45 = vsub.f32 %v925_v53, %v1053_v41  ;;  %v1156_v36 = vmul.f32 %v2581_v60, %v1117_v58 }
 0x273   : > { %v1349_v47 = vadd.f32 %v1317_v25, %v1221_v4  ;;  %v1068_v50 = vsub.f32 %v908_v49, %v1036_v26  ;;  %v1139_v16 = vmul.f32 %v2581_v60, %v1100_v22  ;;  %v1020_v57 = vfloor.f32 %v988_v10 }
 0x274   : > { %v1300_v48 = vfloor.f32 %v1268_v54  ;;  %v1188_v23 = vfloor.f32 %v1156_v36  ;;  %v1252_v40 = vadd.f32 0.5, %v1085_v45  ;;  %v907_v39 = vcvt.s32.f32 %v2731_v55 }
 0x275   : > { %v1381_v1 = vsub.f32 %v1349_v47, %v2273_v38  ;;  %v1171_v28 = vfloor.f32 %v1139_v16  ;;  %v1235_v15 = vadd.f32 0.5, %v1068_v50  ;;  %v1052_v34 = vmul.f32 16.0, %v1020_v57 }
 0x276   : > { %v1332_v29 = vadd.f32 %v1300_v48, %v1204_v43  ;;  %v1220_v31 = vmul.f32 8.0, %v1188_v23  ;;  %v1284_v51 = vmul.f32 %v1252_v40, %v2581_v60  ;;  %v1116_v18 = vadd.f32 0.5, %v1020_v57 }
 0x277   : > { %v1413_v3 = vand.u32 2147483647, %v1381_v1  ;;  %v1203_v53 = vmul.f32 8.0, %v1171_v28  ;;  %v1267_v49 = vmul.f32 %v1235_v15, %v2581_v60  ;;  %v1084_v9 = vsub.f32 %v924_v37, %v1052_v34 }
 0x278   : > { %v1364_v19 = vsub.f32 %v1332_v29, %v2273_v38  ;;  %v1316_v30 = vfloor.f32 %v1284_v51  ;;  %v1155_v5 = vmul.f32 %v2581_v60, %v1116_v18  ;;  %v939_v6 = vadd.f32 0.5, %v907_v39 }
 0x279   : > { %vm1445_vm2 = vcmp.lt.f32.partialorder %v1413_v3, 0.5  ;;  %v1299_v62 = vfloor.f32 %v1267_v49  ;;  %v1251_v21 = vadd.f32 0.5, %v1084_v9  ;;  %v891_v17 = vadd.s32 152, %v2472_v35 }
 0x27a   : > { %1655 = vmatpush.msk.msra.mxu1 %vm1445_vm2, %v2049_v8  ;;  %v1396_v61 = vand.u32 2147483647, %v1364_v19  ;;  %v1348_v7 = vadd.f32 %v1316_v30, %v1220_v31  ;;  %v1187_v52 = vfloor.f32 %v1155_v5  ;;  %v971_v13 = vmul.f32 %v939_v6, %v2279_v44 }
 0x27b   : > { %v1331_v0 = vadd.f32 %v1299_v62, %v1203_v53  ;;  %v1283_v14 = vmul.f32 %v1251_v21, %v2581_v60  ;;  %v923_v59 = vcvt.s32.f32 %v891_v17  ;;  %v874_v24 = vadd.s32 16, %v2472_v35 }
 0x27c   : > { %vm1428_vm3 = vcmp.lt.f32.partialorder %v1396_v61, 0.5  ;;  %v1380_v37 = vsub.f32 %v1348_v7, %v2273_v38  ;;  %v1219_v27 = vmul.f32 8.0, %v1187_v52  ;;  %v1003_v32 = vfloor.f32 %v971_v13 }
 0x27d   : > { %1640 = vmatpush.msk.msra.mxu0 %vm1428_vm3, %v2049_v8  ;;  %v1363_v33 = vsub.f32 %v1331_v0, %v2273_v38  ;;  %v1315_v20 = vfloor.f32 %v1283_v14  ;;  %v955_v4 = vadd.f32 0.5, %v923_v59  ;;  %v906_v2 = vcvt.s32.f32 %v874_v24 }
 0x27e   : > { %v1412_v56 = vand.u32 2147483647, %v1380_v37  ;;  %v1035_v55 = vmul.f32 16.0, %v1003_v32  ;;  %v1099_v12 = vadd.f32 0.5, %v1003_v32  ;;  %v890_v63 = vadd.s32 144, %v2472_v35 }
 0x27f   : > { %v1395_v41 = vand.u32 2147483647, %v1363_v33  ;;  %v1347_v58 = vadd.f32 %v1315_v20, %v1219_v27  ;;  %v987_v25 = vmul.f32 %v955_v4, %v2279_v44  ;;  %v938_v26 = vadd.f32 0.5, %v906_v2 }
 0x280   : > { %vm1444_vm4 = vcmp.lt.f32.partialorder %v1412_v56, 0.5  ;;  %v1067_v22 = vsub.f32 %v907_v39, %v1035_v55  ;;  %v1138_v10 = vmul.f32 %v2581_v60, %v1099_v12  ;;  %v922_v43 = vcvt.s32.f32 %v890_v63 }
 0x281   : > { %1656 = vmatpush.msk.msra.mxu1 %vm1444_vm4, %v2049_v8  ;;  %vm1427_vm5 = vcmp.lt.f32.partialorder %v1395_v41, 0.5  ;;  %v1379_v54 = vsub.f32 %v1347_v58, %v2273_v38  ;;  %v1019_v45 = vfloor.f32 %v987_v25  ;;  %v970_v36 = vmul.f32 %v938_v26, %v2279_v44 }
 0x282   : > { %1641 = vmatpush.msk.msra.mxu0 %vm1427_vm5, %v2049_v8  ;;  %v1170_v47 = vfloor.f32 %v1138_v10  ;;  %v1234_v50 = vadd.f32 0.5, %v1067_v22  ;;  %v954_v16 = vadd.f32 0.5, %v922_v43  ;;  %v873_v57 = vadd.s32 8, %v2472_v35 }
 0x283   : > { %v1411_v48 = vand.u32 2147483647, %v1379_v54  ;;  %v1051_v23 = vmul.f32 16.0, %v1019_v45  ;;  %v1115_v40 = vadd.f32 0.5, %v1019_v45  ;;  %v1002_v39 = vfloor.f32 %v970_v36 }
 0x284   : > { %v1202_v1 = vmul.f32 8.0, %v1170_v47  ;;  %v1266_v28 = vmul.f32 %v1234_v50, %v2581_v60  ;;  %v986_v15 = vmul.f32 %v954_v16, %v2279_v44  ;;  %v905_v34 = vcvt.s32.f32 %v873_v57 }
 0x285   : > { %vm1443_vm6 = vcmp.lt.f32.partialorder %v1411_v48, 0.5  ;;  %v1083_v29 = vsub.f32 %v923_v59, %v1051_v23  ;;  %v1154_v31 = vmul.f32 %v2581_v60, %v1115_v40  ;;  %v1034_v51 = vmul.f32 16.0, %v1002_v39 }
 0x286   : > { %1657 = vmatpush.msk.msra.mxu1 %vm1443_vm6, %v2049_v8  ;;  %v1298_v18 = vfloor.f32 %v1266_v28  ;;  %v1098_v3 = vadd.f32 0.5, %v1002_v39  ;;  %v1018_v53 = vfloor.f32 %v986_v15  ;;  %v937_v49 = vadd.f32 0.5, %v905_v34 }
 0x287   : > { %v1186_v9 = vfloor.f32 %v1154_v31  ;;  %v1250_v19 = vadd.f32 0.5, %v1083_v29  ;;  %v1066_v30 = vsub.f32 %v906_v2, %v1034_v51  ;;  %v889_v5 = vadd.s32 136, %v2472_v35 }
 0x288   : > { %v1330_v6 = vadd.f32 %v1298_v18, %v1202_v1  ;;  %v1137_v62 = vmul.f32 %v2581_v60, %v1098_v3  ;;  %v1050_v21 = vmul.f32 16.0, %v1018_v53  ;;  %v1114_v17 = vadd.f32 0.5, %v1018_v53 }
 0x289   : > { %v1218_v61 = vmul.f32 8.0, %v1186_v9  ;;  %v1282_v7 = vmul.f32 %v1250_v19, %v2581_v60  ;;  %v1233_v52 = vadd.f32 0.5, %v1066_v30  ;;  %v969_v13 = vmul.f32 %v937_v49, %v2279_v44 }
 0x28a   : > { %v1362_v0 = vsub.f32 %v1330_v6, %v2273_v38  ;;  %v1169_v14 = vfloor.f32 %v1137_v62  ;;  %v1082_v59 = vsub.f32 %v922_v43, %v1050_v21  ;;  %v1153_v24 = vmul.f32 %v2581_v60, %v1114_v17 }
 0x28b   : > { %v1314_v37 = vfloor.f32 %v1282_v7  ;;  %v1265_v27 = vmul.f32 %v1233_v52, %v2581_v60  ;;  %v1001_v32 = vfloor.f32 %v969_v13  ;;  %v921_v33 = vcvt.s32.f32 %v889_v5 }
 0x28c   : > { %v1394_v20 = vand.u32 2147483647, %v1362_v0  ;;  %v1201_v4 = vmul.f32 8.0, %v1169_v14  ;;  %v1185_v2 = vfloor.f32 %v1153_v24  ;;  %v1249_v56 = vadd.f32 0.5, %v1082_v59 }
 0x28d   : > { %v1346_v55 = vadd.f32 %v1314_v37, %v1218_v61  ;;  %v1297_v12 = vfloor.f32 %v1265_v27  ;;  %v1033_v63 = vmul.f32 16.0, %v1001_v32  ;;  %v1097_v41 = vadd.f32 0.5, %v1001_v32 }
 0x28e   : > { %vm1426_vm7 = vcmp.lt.f32.partialorder %v1394_v20, 0.5  ;;  %v1217_v58 = vmul.f32 8.0, %v1185_v2  ;;  %v1281_v25 = vmul.f32 %v1249_v56, %v2581_v60  ;;  %v953_v26 = vadd.f32 0.5, %v921_v33 }
 0x28f   : > { %1642 = vmatpush.msk.msra.mxu0 %vm1426_vm7, %v2049_v8  ;;  %v1378_v22 = vsub.f32 %v1346_v55, %v2273_v38  ;;  %v1329_v10 = vadd.f32 %v1297_v12, %v1201_v4  ;;  %v1065_v43 = vsub.f32 %v905_v34, %v1033_v63  ;;  %v1136_v54 = vmul.f32 %v2581_v60, %v1097_v41 }
 0x290   : > { %v1313_v45 = vfloor.f32 %v1281_v25  ;;  %v985_v36 = vmul.f32 %v953_v26, %v2279_v44  ;;  %v904_v47 = vcvt.s32.f32 %v2472_v35  ;;  %v888_v50 = vadd.s32 128, %v2472_v35 }
 0x291   : > { %v1410_v16 = vand.u32 2147483647, %v1378_v22  ;;  %v1361_v57 = vsub.f32 %v1329_v10, %v2273_v38  ;;  %v1168_v48 = vfloor.f32 %v1136_v54  ;;  %v1232_v23 = vadd.f32 0.5, %v1065_v43 }
 0x292   : > { %v1345_v40 = vadd.f32 %v1313_v45, %v1217_v58  ;;  %v1017_v39 = vfloor.f32 %v985_v36  ;;  %v936_v1 = vadd.f32 0.5, %v904_v47  ;;  %v920_v28 = vcvt.s32.f32 %v888_v50 }
 0x293   : > { %vm1442_vm8 = vcmp.lt.f32.partialorder %v1410_v16, 0.5  ;;  %v1393_v15 = vand.u32 2147483647, %v1361_v57  ;;  %v1200_v34 = vmul.f32 8.0, %v1168_v48  ;;  %v1264_v29 = vmul.f32 %v1232_v23, %v2581_v60 }
 0x294   : > { %1658 = vmatpush.msk.msra.mxu1 %vm1442_vm8, %v2049_v8  ;;  %v1377_v31 = vsub.f32 %v1345_v40, %v2273_v38  ;;  %v1049_v51 = vmul.f32 16.0, %v1017_v39  ;;  %v1113_v35 = vadd.f32 0.5, %v1017_v39  ;;  %v968_v18 = vmul.f32 %v936_v1, %v2279_v44 }
 0x295   : > { %vm1425_vm9 = vcmp.lt.f32.partialorder %v1393_v15, 0.5  ;;  %v1296_v3 = vfloor.f32 %v1264_v29  ;;  %v952_v53 = vadd.f32 0.5, %v920_v28  ;;  %v842_v49 = vmul.f32 %v2655_v42, %v2634_v46 }
 0x296   : > { %1643 = vmatpush.msk.msra.mxu0 %vm1425_vm9, %v2049_v8  ;;  %v1409_v9 = vand.u32 2147483647, %v1377_v31  ;;  %v1081_v19 = vsub.f32 %v921_v33, %v1049_v51  ;;  %v1152_v30 = vmul.f32 %v2581_v60, %v1113_v35  ;;  %v1000_v5 = vfloor.f32 %v968_v18 }
 0x297   : > { %1852 = vrcp.f32 %v2637_v11  ;;  %v1328_v6 = vadd.f32 %v1296_v3, %v1200_v34  ;;  %v984_v62 = vmul.f32 %v952_v53, %v2279_v44  ;;  %v843_v21 = vsub.f32 1.0, %v842_v49 }
 0x298   : > { %vm1441_vm10 = vcmp.lt.f32.partialorder %v1409_v9, 0.5  ;;  %v1184_v17 = vfloor.f32 %v1152_v30  ;;  %v1248_v61 = vadd.f32 0.5, %v1081_v19  ;;  %v1032_v7 = vmul.f32 16.0, %v1000_v5 }
 0x299   : > { %1659 = vmatpush.msk.msra.mxu1 %vm1441_vm10, %v2049_v8  ;;  %v1360_v52 = vsub.f32 %v1328_v6, %v2273_v38  ;;  %v1096_v13 = vadd.f32 0.5, %v1000_v5  ;;  %v1016_v0 = vfloor.f32 %v984_v62  ;;  %v844_v37 = vmul.f32 %v2655_v42, %v843_v21 }
 0x29a   : > { %v1216_v14 = vmul.f32 8.0, %v1184_v17  ;;  %v1280_v59 = vmul.f32 %v1248_v61, %v2581_v60  ;;  %v1064_v24 = vsub.f32 %v904_v47, %v1032_v7  ;;  %vm847_vm12 = vweird.f32 %v2655_v42 }
 0x29b   : > { %v1392_v27 = vand.u32 2147483647, %v1360_v52  ;;  %v1135_v44 = vmul.f32 %v2581_v60, %v1096_v13  ;;  %v1048_v32 = vmul.f32 16.0, %v1016_v0  ;;  %v1112_v33 = vadd.f32 0.5, %v1016_v0 }
 0x29c   : > { %v1312_v20 = vfloor.f32 %v1280_v59  ;;  %v1231_v4 = vadd.f32 0.5, %v1064_v24  ;;  %v845_v22 = vadd.f32 %v2655_v42, %v844_v37  ;;  %vm846_vm13 = vweird.f32 %v2634_v46 }
 0x29d   : > { %v1853_v2 = vpop.eup %1852  ;;  %vm1424_vm11 = vcmp.lt.f32.partialorder %v1392_v27, 0.5  ;;  %v1167_v56 = vfloor.f32 %v1135_v44  ;;  %v1080_v55 = vsub.f32 %v920_v28, %v1048_v32  ;;  %v1151_v12 = vmul.f32 %v2581_v60, %v1112_v33  ;;  %vm2803_vm14 = vmor %vm846_vm13, %vm847_vm12 }
 0x29e   : > { %1644 = vmatpush.msk.msra.mxu0 %vm1424_vm11, %v2049_v8  ;;  %v1344_v63 = vadd.f32 %v1312_v20, %v1216_v14  ;;  %v1263_v41 = vmul.f32 %v1231_v4, %v2581_v60  ;;  %v857_v54 = vmul.f32 %v1853_v2, %v2637_v11  ;;  %v852_v47 = vand.u32 2147483648, %v2634_v46 }
 0x29f   : > { %v1199_v58 = vmul.f32 8.0, %v1167_v56  ;;  %v1183_v25 = vfloor.f32 %v1151_v12  ;;  %v1247_v26 = vadd.f32 0.5, %v1080_v55  ;;  %v850_v48 = vand.u32 2147483647, %v2634_v46 }
 0x2a0   : > { %v1376_v10 = vsub.f32 %v1344_v63, %v2273_v38  ;;  %v1295_v43 = vfloor.f32 %v1263_v41  ;;  %v858_v23 = vsub.f32 1.0, %v857_v54  ;;  %v849_v39 = vsel %vm2803_vm14, %v2655_v42, %v845_v22 }
 0x2a1   : > { %v1215_v45 = vmul.f32 8.0, %v1183_v25  ;;  %v1279_v36 = vmul.f32 %v1247_v26, %v2581_v60  ;;  %vm862_vm15 = vweird.f32 %v1853_v2  ;;  %v867_v28 = vand.u32 2147483648, %v2637_v11 }
 0x2a2   : > { %v1408_v50 = vand.u32 2147483647, %v1376_v10  ;;  %v1327_v16 = vadd.f32 %v1295_v43, %v1199_v58  ;;  %v859_v1 = vmul.f32 %v1853_v2, %v858_v23  ;;  %v853_v34 = vor.u32 1.1754944e-38, %v852_v47 }
 0x2a3   : > { %v1311_v40 = vfloor.f32 %v1279_v36  ;;  %v865_v29 = vand.u32 2147483647, %v2637_v11  ;;  %vm851_vm1 = vcmp.eq.f32.partialorder %v850_v48, 8.507059e+37  ;;  %vm861_vm2 = vweird.f32 %v2637_v11 }
 0x2a4   : > { %vm1440_vm0 = vcmp.lt.f32.partialorder %v1408_v50, 0.5  ;;  %v1359_v60 = vsub.f32 %v1327_v16, %v2273_v38  ;;  %v860_v31 = vadd.f32 %v1853_v2, %v859_v1  ;;  %v854_v51 = vsel %vm851_vm1, %v853_v34, %v849_v39  ;;  %vm863_vm3 = vmor %vm861_vm2, %vm862_vm15 }
 0x2a5   : > { %1660 = vmatpush.msk.msra.mxu1 %vm1440_vm0, %v2049_v8  ;;  %v1343_v15 = vadd.f32 %v1311_v40, %v1215_v45  ;;  %v868_v18 = vor.u32 1.1754944e-38, %v867_v28  ;;  %vm866_vm5 = vcmp.eq.f32.partialorder %v865_v29, 8.507059e+37  ;;  %vm1527_vm7 = vcmask 516096  }
 0x2a6   : > { %v1391_v46 = vand.u32 2147483647, %v1359_v60  ;;  %v864_v35 = vsel %vm863_vm3, %v1853_v2, %v860_v31 }
 0x2a7   : > { %v1375_v42 = vsub.f32 %v1343_v15, %v2273_v38  ;;  %v869_v53 = vsel %vm866_vm5, %v868_v18, %v864_v35 }
 0x2a8   : > { %vm1423_vm4 = vcmp.lt.f32.partialorder %v1391_v46, 0.5 }
 0x2a9   : > { %1645 = vmatpush.msk.msra.mxu0 %vm1423_vm4, %v2049_v8  ;;  %v1407_v3 = vand.u32 2147483647, %v1375_v42 }
 0x2aa   : > { %1503 = vmatmul.f32.vlgmr.msra.gmra.mxu0 %v854_v51 }
 0x2ab   : > { %vm1439_vm6 = vcmp.lt.f32.partialorder %v1407_v3, 0.5 }
 0x2ac   : > { %1661 = vmatpush.msk.msra.mxu1 %vm1439_vm6, %v2049_v8 }
 0x2ad   : > { %1523 = vmatmul.f32.vlgmr.msra.gmra.mxu1 %v869_v53 }
 0x327   : > { %v1504_v38 = vpop.f32.mrf.mxu0 }
 0x32a   : > { %v1524_v11 = vpop.f32.mrf.mxu1 }
 0x32b   : > { %v1525_v49 = vadd.f32 %v1524_v11, %v1504_v38 }
 0x32d   : > { %1528 = vst.msk [vmem:[%s175_s17] sm:$0x1] %vm1527_vm7, %v1525_v49 }
 0x32e   : > { %1941 = shalt.err (!%p1938_p11)
}
 0x32f   : > { %1671 = dma.vmem_to_hbm [thread:$0]  (%p2131_p3), %s1541_s18, 16, %s1543_s19, %s1530_s21  }
 0x330 PF: > { %s1554_s28 = sand.u32 1, %s1972_s9   ;;  %p2864_p12 = scmp.ge.s32.totalorder %s1984_s12, 2 }
 0x331   : > { %s1555_s4 = scalar_lea.sflag [#allocation4], %s1554_s28 }
 0x332   : > { %p1682_p13 = pnand %p2864_p12, %p2100_p6 }
 0x334   : > { %p1683_p0 = pneg %p1682_p13 }
 0x336   : > { %1967 = dma.done.wait (%p1683_p0), %s1555_s4, 16  }
 0x337   : > { %1969 = vsyncadd (%p1683_p0), %s1555_s4, 4294967280  ;;  %p16_p5 = scmp.ge.s32.totalorder %s2118_s23, 4   ;;  %s2865_s9 = smov %s1976_s10 }
 0x338   : > { %s2866_s10 = smov %s1980_s11  ;;  %s2867_s11 = smov %s2127_s26 }
 0x339   : > { %s2868_s12 = smov %s2118_s23  ;;  %18 = sbr.rel (!%p16_p5) target bundleno = 6 (0x6), region = 77 }
 0x33e   :  { %1560 = vsyncpa [#allocation3], 1 }
 0x33f   :  { %1562 = vsyncpa [#allocation3 + $0x1], 1 }
 0x340   :  { %1563 = vsyncpa [#allocation6], 1 }
 0x341   :  { %1564 = vsyncpa [#allocation4], 1 }
 0x342   :  { %1566 = vsyncpa [#allocation4 + $0x1], 1 }

</bundles_post_ra>
